<compile_context>
chip_gen: v6e
topology: v6e:2x2x1
jax: 0.10.0
libtpu: 0.0.40
codegen_flags: <defaults>
</compile_context>

<pallas_src>
import functools

import jax
import jax.numpy as jnp
from jax.experimental import pallas as pl
from jax.experimental.pallas import tpu as pltpu


# ----------------------------------------------------------------------------
# Fused kernel: 3x (3x3 conv + bias [+ relu]) + HADARNet head, one chunk of the
# batch (stacked on lanes) per grid step.
# ----------------------------------------------------------------------------
def _fused_kernel(x_ref, mask_ref, w1_ref, b1_ref, w2_ref, b2_ref, w3_ref,
                  b3_ref, o_ref, *, Hp, Wp, Ppad, mm_dtype):
    L = x_ref.shape[-1]

    # Invariant (review): with a 1-pixel halo and 3x3 taps (|delta| <= Wp+1),
    # every *interior* lane p reads taps p+delta inside its own image's
    # [0, Hp*Wp) slab, so pltpu.roll wrap-around only lands on halo / lane-pad
    # lanes that `mask` re-zeros and the wrapper crops.  NOT valid for 5x5
    # taps, stride > 1, or a thinner halo.
    assert Hp >= 3 and Wp >= 3 and Ppad >= Hp * Wp and L % Ppad == 0

    mask = mask_ref[...]                                  # (1, L) f32, 1 = interior

    def conv3x3(act, w_ref_, b_ref_):
        # act: (Cin, L) f32 with zero halo.  w: (3, Cout, 3*Cin), packed
        # (kh)(kw, ci).  Three accumulated MXU matmuls (K = 3*Cin each) instead
        # of one K = 9*Cin pass keep the live im2col operand at 1/3 size.
        acc = b_ref_[...].astype(jnp.float32)             # (Cout, 1) lane-broadcast
        for kh in range(3):
            taps = []
            for kw in range(3):
                # tap[:, p] = act[:, p + delta]  ==  roll by -delta (wrap unused).
                sh = (-((kh - 1) * Wp + (kw - 1))) % L
                taps.append(act if sh == 0 else pltpu.roll(act, shift=sh, axis=1))
            # rolls stay in f32 (32-bit lane rotate); cast once per kh for the MXU.
            patches = jnp.concatenate(taps, axis=0).astype(mm_dtype)   # (3*Cin, L)
            acc = acc + jnp.dot(w_ref_[kh], patches,
                                preferred_element_type=jnp.float32)    # (Cout, L)
        return acc

    xf = x_ref[0].astype(jnp.float32)                     # (Cin_pad, L), zero halo
    h1 = jnp.maximum(conv3x3(xf, w1_ref, b1_ref), 0.0) * mask   # re-zero halo/pad
    h2 = jnp.maximum(conv3x3(h1, w2_ref, b2_ref), 0.0) * mask
    p = conv3x3(h2, w3_ref, b3_ref) * mask                # zero halo -> no exp(junk)

    # HADARNet head fused into the epilogue: sigmoid(ch 0), relu(ch 1), identity.
    # exp/divide only on the ch-0 sublane slice (EUP work on 1 row, not Cout_pad).
    sig = 1.0 / (1.0 + jnp.exp(-p[0:1]))
    out = jnp.concatenate([sig, jnp.maximum(p[1:2], 0.0), p[2:]], axis=0)
    o_ref[0] = out.astype(o_ref.dtype)


# ----------------------------------------------------------------------------
# Host-side packing / wrapper.
# ----------------------------------------------------------------------------
def _round_up(v, m):
    return (v + m - 1) // m * m


def _pack_conv(w, b):
    # (3, 3, Cin, Cout) HWIO + (Cout,) -> per-kh packed weights (3, Coutp, 3*Cinp)
    # with K ordered (kw, ci), and bias (Coutp, 1).  Channels are zero-padded to
    # multiples of 8 so im2col tap blocks are sublane-aligned and stores are
    # full sublanes; the extra zero K rows are free on the MXU.
    kh, kw, cin, cout = w.shape
    cinp, coutp = _round_up(cin, 8), _round_up(cout, 8)
    wp = jnp.pad(w, ((0, 0), (0, 0), (0, cinp - cin), (0, coutp - cout)))
    wp = jnp.transpose(wp, (0, 3, 1, 2)).reshape(kh, coutp, kw * cinp)
    bp = jnp.pad(b, (0, coutp - cout)).reshape(coutp, 1).astype(jnp.float32)
    return wp, bp


def _default_chunks(n):
    # One lane-stacked chunk per TensorCore: v7x (and v3/v4/v5p megacore parts)
    # have 2 TCs per chip, so keep a 2-way "parallel" grid there; single-TC
    # v5e/v6e get one fat grid step (amortizes the ~0.35us/step overhead).
    try:
        kind = jax.devices()[0].device_kind.lower()
    except Exception:
        return 1
    two_tc = any(t in kind for t in ("v7", "7x", "v3", "v4", "v5p"))
    c = 2 if (two_tc and n >= 2) else 1
    return c if n % c == 0 else 1


@functools.partial(jax.jit, static_argnames=("num_chunks", "matmul_dtype"))
def hadarnet_forward(x_nchw, params, *, num_chunks=None,
                     matmul_dtype=jnp.bfloat16):
    N, Cin, H, W = x_nchw.shape
    if num_chunks is None:
        num_chunks = _default_chunks(N)
    assert N % num_chunks == 0
    imgs = N // num_chunks

    Hp, Wp = H + 2, W + 2
    P = Hp * Wp
    Ppad = _round_up(P, 128)          # 128-aligned per-image lane slab
    L = imgs * Ppad                   # images of one chunk stacked on lanes

    # ---- pack weights / biases (channels padded to multiples of 8) ----------
    w1p, b1p = _pack_conv(params["w1"], params["b1"])
    w2p, b2p = _pack_conv(params["w2"], params["b2"])
    w3p, b3p = _pack_conv(params["w3"], params["b3"])
    w1p, w2p, w3p = (w.astype(matmul_dtype) for w in (w1p, w2p, w3p))
    cin_pad = w1p.shape[-1] // 3
    cout = params["w3"].shape[-1]
    cout_pad = w3p.shape[1]
    assert cin_pad == _round_up(Cin, 8)

    # ---- activations: (chunk, Cin_pad, imgs*Ppad) lane-dense slabs -----------
    xp = jnp.pad(x_nchw, ((0, 0), (0, cin_pad - Cin), (1, 1), (1, 1)))
    xp = jnp.pad(xp.reshape(N, cin_pad, P), ((0, 0), (0, 0), (0, Ppad - P)))
    xp = xp.reshape(num_chunks, imgs, cin_pad, Ppad).transpose(0, 2, 1, 3)
    xp = xp.reshape(num_chunks, cin_pad, L)

    # interior mask (1 inside the original HxW image, 0 on halo / lane padding),
    # built host-side once so the kernel does no vector integer div/mod.
    r = jnp.arange(Ppad, dtype=jnp.int32)
    row, col = r // Wp, r % Wp
    inner = (row >= 1) & (row <= Hp - 2) & (col >= 1) & (col <= Wp - 2) & (r < P)
    mask = jnp.tile(inner.astype(jnp.float32)[None, :], (1, imgs))      # (1, L)

    kernel = functools.partial(_fused_kernel, Hp=Hp, Wp=Wp, Ppad=Ppad,
                               mm_dtype=matmul_dtype)
    out_p = pl.pallas_call(
        kernel,
        out_shape=jax.ShapeDtypeStruct((num_chunks, cout_pad, L), x_nchw.dtype),
        grid_spec=pltpu.PrefetchScalarGridSpec(
            num_scalar_prefetch=0,
            grid=(num_chunks,),
            in_specs=[
                pl.BlockSpec((1, cin_pad, L), lambda c: (c, 0, 0)),
                pl.BlockSpec((1, L), lambda c: (0, 0)),
                pl.BlockSpec(w1p.shape, lambda c: (0, 0, 0)),
                pl.BlockSpec(b1p.shape, lambda c: (0, 0)),
                pl.BlockSpec(w2p.shape, lambda c: (0, 0, 0)),
                pl.BlockSpec(b2p.shape, lambda c: (0, 0)),
                pl.BlockSpec(w3p.shape, lambda c: (0, 0, 0)),
                pl.BlockSpec(b3p.shape, lambda c: (0, 0)),
            ],
            out_specs=pl.BlockSpec((1, cout_pad, L), lambda c: (c, 0, 0)),
        ),
        compiler_params=pltpu.CompilerParams(
            dimension_semantics=("parallel",),     # shard chunks across v7x TCs
            vmem_limit_bytes=32 * 1024 * 1024),
    )(xp, mask, w1p, b1p, w2p, b2p, w3p, b3p)

    # undo the lane packing: (chunks, Coutp, imgs*Ppad) -> NCHW, crop pad + halo.
    out_p = out_p.reshape(num_chunks, cout_pad, imgs, Ppad).transpose(0, 2, 1, 3)
    out_p = out_p.reshape(N, cout_pad, Ppad)[:, :cout, :P]
    return out_p.reshape(N, cout, Hp, Wp)[:, :, 1:H + 1, 1:W + 1]


# ----------------------------------------------------------------------------
# Deterministic parameter construction.
# ----------------------------------------------------------------------------
def init_params(key, in_channels=3, hidden=16, out_channels=6):
    ks = jax.random.split(key, 6)

    def conv_w(k, cin, cout):
        fan_in = 3 * 3 * cin
        return (jax.random.normal(k, (3, 3, cin, cout), jnp.float32)
                * (2.0 / fan_in) ** 0.5)

    return {
        "w1": conv_w(ks[0], in_channels, hidden),
        "b1": 0.01 * jax.random.normal(ks[1], (hidden,), jnp.float32),
        "w2": conv_w(ks[2], hidden, hidden),
        "b2": 0.01 * jax.random.normal(ks[3], (hidden,), jnp.float32),
        "w3": conv_w(ks[4], hidden, out_channels),
        "b3": 0.01 * jax.random.normal(ks[5], (out_channels,), jnp.float32),
    }


# ----------------------------------------------------------------------------
# Pure-JAX reference (correctness check only).
# ----------------------------------------------------------------------------
def _ref_forward(x_nchw, params):
    x = jnp.transpose(x_nchw, (0, 2, 3, 1))

    def conv(h, w, b, relu):
        y = jax.lax.conv_general_dilated(
            h, w, window_strides=(1, 1), padding="SAME",
            dimension_numbers=("NHWC", "HWIO", "NHWC")) + b
        return jnp.maximum(y, 0.0) if relu else y

    h = conv(x, params["w1"], params["b1"], True)
    h = conv(h, params["w2"], params["b2"], True)
    p = conv(h, params["w3"], params["b3"], False)
    p = jnp.concatenate(
        [jax.nn.sigmoid(p[..., 0:1]), jnp.maximum(p[..., 1:2], 0.0), p[..., 2:]],
        axis=-1)
    return jnp.transpose(p, (0, 3, 1, 2))


if __name__ == "__main__":
    key = jax.random.PRNGKey(0)
    k_x, k_p = jax.random.split(key)

    N, C_IN, H, W = 2, 3, 16, 16          # in_channels=3 as in the module default
    x = jax.random.normal(k_x, (N, C_IN, H, W), jnp.float32)
    params = init_params(k_p, in_channels=C_IN, hidden=16, out_channels=6)

    ref = _ref_forward(x, params)

    # Production path: bf16 MXU operands, f32 accumulate / epilogue.
    out = jax.block_until_ready(hadarnet_forward(x, params))
    assert out.shape == (N, 6, H, W), out.shape
    assert jnp.allclose(out, ref, atol=1e-1, rtol=1e-1), "bf16-matmul path mismatch"
    assert jnp.all(jnp.isfinite(out)), "non-finite values in output"

    # f32-operand path for a tight numerical check of the kernel structure.
    out_f32 = jax.block_until_ready(
        hadarnet_forward(x, params, matmul_dtype=jnp.float32))
    assert jnp.allclose(out_f32, ref, atol=1e-4, rtol=1e-4), "f32 path mismatch"

    print("KERNEL_OK")
</pallas_src>

<mosaic_0001>
module attributes {stable_mosaic.version = 11 : i64} {
  func.func @_fused_kernel(%arg0: i32, %arg1: memref<1x8x768xf32, #tpu.memory_space<vmem>>, %arg2: memref<1x768xf32, #tpu.memory_space<vmem>>, %arg3: memref<3x16x24xbf16, #tpu.memory_space<vmem>>, %arg4: memref<16x1xf32, #tpu.memory_space<vmem>>, %arg5: memref<3x16x48xbf16, #tpu.memory_space<vmem>>, %arg6: memref<16x1xf32, #tpu.memory_space<vmem>>, %arg7: memref<3x8x48xbf16, #tpu.memory_space<vmem>>, %arg8: memref<8x1xf32, #tpu.memory_space<vmem>>, %arg9: memref<1x8x768xf32, #tpu.memory_space<vmem>>) attributes {dimension_semantics = [#tpu.dimension_semantics<parallel>], iteration_bounds = array<i64: 1>, scalar_prefetch = 0 : i64, scratch_operands = 0 : i64, tpu.core_type = #tpu.core_type<tc>, window_params = [{transform_indices = @transform_0, window_bounds = array<i64: 1, 8, 768>}, {pipeline_mode = #tpu.pipeline_mode<synchronous>, transform_indices = @transform_1, window_bounds = array<i64: 1, 768>}, {pipeline_mode = #tpu.pipeline_mode<synchronous>, transform_indices = @transform_2, window_bounds = array<i64: 3, 16, 24>}, {pipeline_mode = #tpu.pipeline_mode<synchronous>, transform_indices = @transform_3, window_bounds = array<i64: 16, 1>}, {pipeline_mode = #tpu.pipeline_mode<synchronous>, transform_indices = @transform_4, window_bounds = array<i64: 3, 16, 48>}, {pipeline_mode = #tpu.pipeline_mode<synchronous>, transform_indices = @transform_5, window_bounds = array<i64: 16, 1>}, {pipeline_mode = #tpu.pipeline_mode<synchronous>, transform_indices = @transform_6, window_bounds = array<i64: 3, 8, 48>}, {pipeline_mode = #tpu.pipeline_mode<synchronous>, transform_indices = @transform_7, window_bounds = array<i64: 8, 1>}, {transform_indices = @transform_8, window_bounds = array<i64: 1, 8, 768>}]} {
    %c0 = arith.constant 0 : index
    %c0_0 = arith.constant 0 : index
    %0 = vector.load %arg2[%c0, %c0_0] : memref<1x768xf32, #tpu.memory_space<vmem>>, vector<1x768xf32>
    %c0_1 = arith.constant 0 : index
    %c0_2 = arith.constant 0 : index
    %c0_3 = arith.constant 0 : index
    %1 = vector.load %arg1[%c0_1, %c0_2, %c0_3] : memref<1x8x768xf32, #tpu.memory_space<vmem>>, vector<1x8x768xf32>
    %2 = vector.shape_cast %1 : vector<1x8x768xf32> to vector<8x768xf32>
    %c0_4 = arith.constant 0 : index
    %c0_5 = arith.constant 0 : index
    %3 = vector.load %arg4[%c0_4, %c0_5] : memref<16x1xf32, #tpu.memory_space<vmem>>, vector<16x1xf32>
    %c19_i32 = arith.constant 19 : i32
    %4 = tpu.dynamic_rotate %2 by %c19_i32 dim 1 : vector<8x768xf32>, i32 -> vector<8x768xf32>
    %c18_i32 = arith.constant 18 : i32
    %5 = tpu.dynamic_rotate %2 by %c18_i32 dim 1 : vector<8x768xf32>, i32 -> vector<8x768xf32>
    %c17_i32 = arith.constant 17 : i32
    %6 = tpu.dynamic_rotate %2 by %c17_i32 dim 1 : vector<8x768xf32>, i32 -> vector<8x768xf32>
    %7 = tpu.concatenate %4, %5, %6 in 0 : vector<8x768xf32>, vector<8x768xf32>, vector<8x768xf32> -> vector<24x768xf32>
    %8 = arith.truncf %7 : vector<24x768xf32> to vector<24x768xbf16>
    %c0_6 = arith.constant 0 : index
    %c0_7 = arith.constant 0 : index
    %c0_8 = arith.constant 0 : index
    %9 = vector.load %arg3[%c0_6, %c0_7, %c0_8] : memref<3x16x24xbf16, #tpu.memory_space<vmem>>, vector<1x16x24xbf16>
    %10 = vector.shape_cast %9 : vector<1x16x24xbf16> to vector<16x24xbf16>
    %cst = arith.constant dense<0.000000e+00> : vector<16x768xf32>
    %11 = tpu.matmul %10, %8, %cst {dimension_numbers = #tpu.dot_dimension_numbers<[1], [0], [0], [1], [0, 0, 1, 1], [], []>} : vector<16x24xbf16>, vector<24x768xbf16>, vector<16x768xf32> -> vector<16x768xf32>
    %12 = vector.broadcast %3 : vector<16x1xf32> to vector<16x768xf32>
    %13 = arith.addf %12, %11 : vector<16x768xf32>
    %c1_i32 = arith.constant 1 : i32
    %14 = tpu.dynamic_rotate %2 by %c1_i32 dim 1 : vector<8x768xf32>, i32 -> vector<8x768xf32>
    %c767_i32 = arith.constant 767 : i32
    %15 = tpu.dynamic_rotate %2 by %c767_i32 dim 1 : vector<8x768xf32>, i32 -> vector<8x768xf32>
    %16 = tpu.concatenate %14, %2, %15 in 0 : vector<8x768xf32>, vector<8x768xf32>, vector<8x768xf32> -> vector<24x768xf32>
    %17 = arith.truncf %16 : vector<24x768xf32> to vector<24x768xbf16>
    %c1 = arith.constant 1 : index
    %c0_9 = arith.constant 0 : index
    %c0_10 = arith.constant 0 : index
    %18 = vector.load %arg3[%c1, %c0_9, %c0_10] : memref<3x16x24xbf16, #tpu.memory_space<vmem>>, vector<1x16x24xbf16>
    %19 = vector.shape_cast %18 : vector<1x16x24xbf16> to vector<16x24xbf16>
    %cst_11 = arith.constant dense<0.000000e+00> : vector<16x768xf32>
    %20 = tpu.matmul %19, %17, %cst_11 {dimension_numbers = #tpu.dot_dimension_numbers<[1], [0], [0], [1], [0, 0, 1, 1], [], []>} : vector<16x24xbf16>, vector<24x768xbf16>, vector<16x768xf32> -> vector<16x768xf32>
    %21 = arith.addf %13, %20 : vector<16x768xf32>
    %c751_i32 = arith.constant 751 : i32
    %22 = tpu.dynamic_rotate %2 by %c751_i32 dim 1 : vector<8x768xf32>, i32 -> vector<8x768xf32>
    %c750_i32 = arith.constant 750 : i32
    %23 = tpu.dynamic_rotate %2 by %c750_i32 dim 1 : vector<8x768xf32>, i32 -> vector<8x768xf32>
    %c749_i32 = arith.constant 749 : i32
    %24 = tpu.dynamic_rotate %2 by %c749_i32 dim 1 : vector<8x768xf32>, i32 -> vector<8x768xf32>
    %25 = tpu.concatenate %22, %23, %24 in 0 : vector<8x768xf32>, vector<8x768xf32>, vector<8x768xf32> -> vector<24x768xf32>
    %26 = arith.truncf %25 : vector<24x768xf32> to vector<24x768xbf16>
    %c2 = arith.constant 2 : index
    %c0_12 = arith.constant 0 : index
    %c0_13 = arith.constant 0 : index
    %27 = vector.load %arg3[%c2, %c0_12, %c0_13] : memref<3x16x24xbf16, #tpu.memory_space<vmem>>, vector<1x16x24xbf16>
    %28 = vector.shape_cast %27 : vector<1x16x24xbf16> to vector<16x24xbf16>
    %cst_14 = arith.constant dense<0.000000e+00> : vector<16x768xf32>
    %29 = tpu.matmul %28, %26, %cst_14 {dimension_numbers = #tpu.dot_dimension_numbers<[1], [0], [0], [1], [0, 0, 1, 1], [], []>} : vector<16x24xbf16>, vector<24x768xbf16>, vector<16x768xf32> -> vector<16x768xf32>
    %30 = arith.addf %21, %29 : vector<16x768xf32>
    %cst_15 = arith.constant 0.000000e+00 : f32
    %31 = vector.broadcast %cst_15 : f32 to vector<16x768xf32>
    %32 = arith.maximumf %30, %31 : vector<16x768xf32>
    %33 = vector.broadcast %0 : vector<1x768xf32> to vector<16x768xf32>
    %34 = arith.mulf %32, %33 : vector<16x768xf32>
    %c0_16 = arith.constant 0 : index
    %c0_17 = arith.constant 0 : index
    %35 = vector.load %arg6[%c0_16, %c0_17] : memref<16x1xf32, #tpu.memory_space<vmem>>, vector<16x1xf32>
    %c19_i32_18 = arith.constant 19 : i32
    %36 = tpu.dynamic_rotate %34 by %c19_i32_18 dim 1 : vector<16x768xf32>, i32 -> vector<16x768xf32>
    %c18_i32_19 = arith.constant 18 : i32
    %37 = tpu.dynamic_rotate %34 by %c18_i32_19 dim 1 : vector<16x768xf32>, i32 -> vector<16x768xf32>
    %c17_i32_20 = arith.constant 17 : i32
    %38 = tpu.dynamic_rotate %34 by %c17_i32_20 dim 1 : vector<16x768xf32>, i32 -> vector<16x768xf32>
    %39 = tpu.concatenate %36, %37, %38 in 0 : vector<16x768xf32>, vector<16x768xf32>, vector<16x768xf32> -> vector<48x768xf32>
    %40 = arith.truncf %39 : vector<48x768xf32> to vector<48x768xbf16>
    %c0_21 = arith.constant 0 : index
    %c0_22 = arith.constant 0 : index
    %c0_23 = arith.constant 0 : index
    %41 = vector.load %arg5[%c0_21, %c0_22, %c0_23] : memref<3x16x48xbf16, #tpu.memory_space<vmem>>, vector<1x16x48xbf16>
    %42 = vector.shape_cast %41 : vector<1x16x48xbf16> to vector<16x48xbf16>
    %cst_24 = arith.constant dense<0.000000e+00> : vector<16x768xf32>
    %43 = tpu.matmul %42, %40, %cst_24 {dimension_numbers = #tpu.dot_dimension_numbers<[1], [0], [0], [1], [0, 0, 1, 1], [], []>} : vector<16x48xbf16>, vector<48x768xbf16>, vector<16x768xf32> -> vector<16x768xf32>
    %44 = vector.broadcast %35 : vector<16x1xf32> to vector<16x768xf32>
    %45 = arith.addf %44, %43 : vector<16x768xf32>
    %c1_i32_25 = arith.constant 1 : i32
    %46 = tpu.dynamic_rotate %34 by %c1_i32_25 dim 1 : vector<16x768xf32>, i32 -> vector<16x768xf32>
    %c767_i32_26 = arith.constant 767 : i32
    %47 = tpu.dynamic_rotate %34 by %c767_i32_26 dim 1 : vector<16x768xf32>, i32 -> vector<16x768xf32>
    %48 = tpu.concatenate %46, %34, %47 in 0 : vector<16x768xf32>, vector<16x768xf32>, vector<16x768xf32> -> vector<48x768xf32>
    %49 = arith.truncf %48 : vector<48x768xf32> to vector<48x768xbf16>
    %c1_27 = arith.constant 1 : index
    %c0_28 = arith.constant 0 : index
    %c0_29 = arith.constant 0 : index
    %50 = vector.load %arg5[%c1_27, %c0_28, %c0_29] : memref<3x16x48xbf16, #tpu.memory_space<vmem>>, vector<1x16x48xbf16>
    %51 = vector.shape_cast %50 : vector<1x16x48xbf16> to vector<16x48xbf16>
    %cst_30 = arith.constant dense<0.000000e+00> : vector<16x768xf32>
    %52 = tpu.matmul %51, %49, %cst_30 {dimension_numbers = #tpu.dot_dimension_numbers<[1], [0], [0], [1], [0, 0, 1, 1], [], []>} : vector<16x48xbf16>, vector<48x768xbf16>, vector<16x768xf32> -> vector<16x768xf32>
    %53 = arith.addf %45, %52 : vector<16x768xf32>
    %c751_i32_31 = arith.constant 751 : i32
    %54 = tpu.dynamic_rotate %34 by %c751_i32_31 dim 1 : vector<16x768xf32>, i32 -> vector<16x768xf32>
    %c750_i32_32 = arith.constant 750 : i32
    %55 = tpu.dynamic_rotate %34 by %c750_i32_32 dim 1 : vector<16x768xf32>, i32 -> vector<16x768xf32>
    %c749_i32_33 = arith.constant 749 : i32
    %56 = tpu.dynamic_rotate %34 by %c749_i32_33 dim 1 : vector<16x768xf32>, i32 -> vector<16x768xf32>
    %57 = tpu.concatenate %54, %55, %56 in 0 : vector<16x768xf32>, vector<16x768xf32>, vector<16x768xf32> -> vector<48x768xf32>
    %58 = arith.truncf %57 : vector<48x768xf32> to vector<48x768xbf16>
    %c2_34 = arith.constant 2 : index
    %c0_35 = arith.constant 0 : index
    %c0_36 = arith.constant 0 : index
    %59 = vector.load %arg5[%c2_34, %c0_35, %c0_36] : memref<3x16x48xbf16, #tpu.memory_space<vmem>>, vector<1x16x48xbf16>
    %60 = vector.shape_cast %59 : vector<1x16x48xbf16> to vector<16x48xbf16>
    %cst_37 = arith.constant dense<0.000000e+00> : vector<16x768xf32>
    %61 = tpu.matmul %60, %58, %cst_37 {dimension_numbers = #tpu.dot_dimension_numbers<[1], [0], [0], [1], [0, 0, 1, 1], [], []>} : vector<16x48xbf16>, vector<48x768xbf16>, vector<16x768xf32> -> vector<16x768xf32>
    %62 = arith.addf %53, %61 : vector<16x768xf32>
    %cst_38 = arith.constant 0.000000e+00 : f32
    %63 = vector.broadcast %cst_38 : f32 to vector<16x768xf32>
    %64 = arith.maximumf %62, %63 : vector<16x768xf32>
    %65 = vector.broadcast %0 : vector<1x768xf32> to vector<16x768xf32>
    %66 = arith.mulf %64, %65 : vector<16x768xf32>
    %c0_39 = arith.constant 0 : index
    %c0_40 = arith.constant 0 : index
    %67 = vector.load %arg8[%c0_39, %c0_40] : memref<8x1xf32, #tpu.memory_space<vmem>>, vector<8x1xf32>
    %c19_i32_41 = arith.constant 19 : i32
    %68 = tpu.dynamic_rotate %66 by %c19_i32_41 dim 1 : vector<16x768xf32>, i32 -> vector<16x768xf32>
    %c18_i32_42 = arith.constant 18 : i32
    %69 = tpu.dynamic_rotate %66 by %c18_i32_42 dim 1 : vector<16x768xf32>, i32 -> vector<16x768xf32>
    %c17_i32_43 = arith.constant 17 : i32
    %70 = tpu.dynamic_rotate %66 by %c17_i32_43 dim 1 : vector<16x768xf32>, i32 -> vector<16x768xf32>
    %71 = tpu.concatenate %68, %69, %70 in 0 : vector<16x768xf32>, vector<16x768xf32>, vector<16x768xf32> -> vector<48x768xf32>
    %72 = arith.truncf %71 : vector<48x768xf32> to vector<48x768xbf16>
    %c0_44 = arith.constant 0 : index
    %c0_45 = arith.constant 0 : index
    %c0_46 = arith.constant 0 : index
    %73 = vector.load %arg7[%c0_44, %c0_45, %c0_46] : memref<3x8x48xbf16, #tpu.memory_space<vmem>>, vector<1x8x48xbf16>
    %74 = vector.shape_cast %73 : vector<1x8x48xbf16> to vector<8x48xbf16>
    %cst_47 = arith.constant dense<0.000000e+00> : vector<8x768xf32>
    %75 = tpu.matmul %74, %72, %cst_47 {dimension_numbers = #tpu.dot_dimension_numbers<[1], [0], [0], [1], [0, 0, 1, 1], [], []>} : vector<8x48xbf16>, vector<48x768xbf16>, vector<8x768xf32> -> vector<8x768xf32>
    %76 = vector.broadcast %67 : vector<8x1xf32> to vector<8x768xf32>
    %77 = arith.addf %76, %75 : vector<8x768xf32>
    %c1_i32_48 = arith.constant 1 : i32
    %78 = tpu.dynamic_rotate %66 by %c1_i32_48 dim 1 : vector<16x768xf32>, i32 -> vector<16x768xf32>
    %c767_i32_49 = arith.constant 767 : i32
    %79 = tpu.dynamic_rotate %66 by %c767_i32_49 dim 1 : vector<16x768xf32>, i32 -> vector<16x768xf32>
    %80 = tpu.concatenate %78, %66, %79 in 0 : vector<16x768xf32>, vector<16x768xf32>, vector<16x768xf32> -> vector<48x768xf32>
    %81 = arith.truncf %80 : vector<48x768xf32> to vector<48x768xbf16>
    %c1_50 = arith.constant 1 : index
    %c0_51 = arith.constant 0 : index
    %c0_52 = arith.constant 0 : index
    %82 = vector.load %arg7[%c1_50, %c0_51, %c0_52] : memref<3x8x48xbf16, #tpu.memory_space<vmem>>, vector<1x8x48xbf16>
    %83 = vector.shape_cast %82 : vector<1x8x48xbf16> to vector<8x48xbf16>
    %cst_53 = arith.constant dense<0.000000e+00> : vector<8x768xf32>
    %84 = tpu.matmul %83, %81, %cst_53 {dimension_numbers = #tpu.dot_dimension_numbers<[1], [0], [0], [1], [0, 0, 1, 1], [], []>} : vector<8x48xbf16>, vector<48x768xbf16>, vector<8x768xf32> -> vector<8x768xf32>
    %85 = arith.addf %77, %84 : vector<8x768xf32>
    %c751_i32_54 = arith.constant 751 : i32
    %86 = tpu.dynamic_rotate %66 by %c751_i32_54 dim 1 : vector<16x768xf32>, i32 -> vector<16x768xf32>
    %c750_i32_55 = arith.constant 750 : i32
    %87 = tpu.dynamic_rotate %66 by %c750_i32_55 dim 1 : vector<16x768xf32>, i32 -> vector<16x768xf32>
    %c749_i32_56 = arith.constant 749 : i32
    %88 = tpu.dynamic_rotate %66 by %c749_i32_56 dim 1 : vector<16x768xf32>, i32 -> vector<16x768xf32>
    %89 = tpu.concatenate %86, %87, %88 in 0 : vector<16x768xf32>, vector<16x768xf32>, vector<16x768xf32> -> vector<48x768xf32>
    %90 = arith.truncf %89 : vector<48x768xf32> to vector<48x768xbf16>
    %c2_57 = arith.constant 2 : index
    %c0_58 = arith.constant 0 : index
    %c0_59 = arith.constant 0 : index
    %91 = vector.load %arg7[%c2_57, %c0_58, %c0_59] : memref<3x8x48xbf16, #tpu.memory_space<vmem>>, vector<1x8x48xbf16>
    %92 = vector.shape_cast %91 : vector<1x8x48xbf16> to vector<8x48xbf16>
    %cst_60 = arith.constant dense<0.000000e+00> : vector<8x768xf32>
    %93 = tpu.matmul %92, %90, %cst_60 {dimension_numbers = #tpu.dot_dimension_numbers<[1], [0], [0], [1], [0, 0, 1, 1], [], []>} : vector<8x48xbf16>, vector<48x768xbf16>, vector<8x768xf32> -> vector<8x768xf32>
    %94 = arith.addf %85, %93 : vector<8x768xf32>
    %95 = vector.broadcast %0 : vector<1x768xf32> to vector<8x768xf32>
    %96 = arith.mulf %94, %95 : vector<8x768xf32>
    %97 = vector.extract_strided_slice %96 {offsets = [0, 0], sizes = [1, 768], strides = [1, 1]} : vector<8x768xf32> to vector<1x768xf32>
    %cst_61 = arith.constant 0.000000e+00 : f32
    %98 = vector.broadcast %cst_61 : f32 to vector<1x768xf32>
    %99 = arith.subf %98, %97 : vector<1x768xf32>
    %100 = math.exp %99 : vector<1x768xf32>
    %cst_62 = arith.constant 1.000000e+00 : f32
    %101 = vector.broadcast %cst_62 : f32 to vector<1x768xf32>
    %102 = arith.addf %101, %100 : vector<1x768xf32>
    %cst_63 = arith.constant 1.000000e+00 : f32
    %103 = vector.broadcast %cst_63 : f32 to vector<1x768xf32>
    %104 = arith.divf %103, %102 : vector<1x768xf32>
    %105 = vector.extract_strided_slice %96 {offsets = [1, 0], sizes = [1, 768], strides = [1, 1]} : vector<8x768xf32> to vector<1x768xf32>
    %cst_64 = arith.constant 0.000000e+00 : f32
    %106 = vector.broadcast %cst_64 : f32 to vector<1x768xf32>
    %107 = arith.maximumf %105, %106 : vector<1x768xf32>
    %108 = vector.extract_strided_slice %96 {offsets = [2, 0], sizes = [6, 768], strides = [1, 1]} : vector<8x768xf32> to vector<6x768xf32>
    %109 = tpu.concatenate %104, %107, %108 in 0 : vector<1x768xf32>, vector<1x768xf32>, vector<6x768xf32> -> vector<8x768xf32>
    %c0_65 = arith.constant 0 : index
    %c0_66 = arith.constant 0 : index
    %c0_67 = arith.constant 0 : index
    %110 = vector.load %arg9[%c0_65, %c0_66, %c0_67] : memref<1x8x768xf32, #tpu.memory_space<vmem>>, vector<1x8x768xf32>
    %111 = vector.shape_cast %110 : vector<1x8x768xf32> to vector<8x768xf32>
    %112 = vector.shape_cast %109 : vector<8x768xf32> to vector<1x8x768xf32>
    tpu.vector_store %arg9[%c0_65, %c0_66, %c0_67], %112 {strides = array<i32>} : memref<1x8x768xf32, #tpu.memory_space<vmem>>, vector<1x8x768xf32>,
    return
  }
  func.func @transform_0(%arg0: i32) -> (i32, i32, i32) {
    %c0_i32 = arith.constant 0 : i32
    %c0_i32_0 = arith.constant 0 : i32
    %c0_i32_1 = arith.constant 0 : i32
    return %arg0, %c0_i32, %c0_i32_0 : i32, i32, i32
  }
  func.func @transform_1(%arg0: i32) -> (i32, i32) {
    %c0_i32 = arith.constant 0 : i32
    %c0_i32_0 = arith.constant 0 : i32
    %c0_i32_1 = arith.constant 0 : i32
    return %c0_i32, %c0_i32_0 : i32, i32
  }
  func.func @transform_2(%arg0: i32) -> (i32, i32, i32) {
    %c0_i32 = arith.constant 0 : i32
    %c0_i32_0 = arith.constant 0 : i32
    %c0_i32_1 = arith.constant 0 : i32
    %c0_i32_2 = arith.constant 0 : i32
    return %c0_i32, %c0_i32_0, %c0_i32_1 : i32, i32, i32
  }
  func.func @transform_3(%arg0: i32) -> (i32, i32) {
    %c0_i32 = arith.constant 0 : i32
    %c0_i32_0 = arith.constant 0 : i32
    %c0_i32_1 = arith.constant 0 : i32
    return %c0_i32, %c0_i32_0 : i32, i32
  }
  func.func @transform_4(%arg0: i32) -> (i32, i32, i32) {
    %c0_i32 = arith.constant 0 : i32
    %c0_i32_0 = arith.constant 0 : i32
    %c0_i32_1 = arith.constant 0 : i32
    %c0_i32_2 = arith.constant 0 : i32
    return %c0_i32, %c0_i32_0, %c0_i32_1 : i32, i32, i32
  }
  func.func @transform_5(%arg0: i32) -> (i32, i32) {
    %c0_i32 = arith.constant 0 : i32
    %c0_i32_0 = arith.constant 0 : i32
    %c0_i32_1 = arith.constant 0 : i32
    return %c0_i32, %c0_i32_0 : i32, i32
  }
  func.func @transform_6(%arg0: i32) -> (i32, i32, i32) {
    %c0_i32 = arith.constant 0 : i32
    %c0_i32_0 = arith.constant 0 : i32
    %c0_i32_1 = arith.constant 0 : i32
    %c0_i32_2 = arith.constant 0 : i32
    return %c0_i32, %c0_i32_0, %c0_i32_1 : i32, i32, i32
  }
  func.func @transform_7(%arg0: i32) -> (i32, i32) {
    %c0_i32 = arith.constant 0 : i32
    %c0_i32_0 = arith.constant 0 : i32
    %c0_i32_1 = arith.constant 0 : i32
    return %c0_i32, %c0_i32_0 : i32, i32
  }
  func.func @transform_8(%arg0: i32) -> (i32, i32, i32) {
    %c0_i32 = arith.constant 0 : i32
    %c0_i32_0 = arith.constant 0 : i32
    %c0_i32_1 = arith.constant 0 : i32
    return %arg0, %c0_i32, %c0_i32_0 : i32, i32, i32
  }
}

</mosaic_0001>

<bundles_post_ra>
// kernel: hadarnet_forward.1
= control target key start
LH: loop header
LB: loop body
LE: loop exit
PB: predicated region body
PF: predicated region fallthrough
CT: control target
= control target key end

     0   :  { %s3133_s13 = smov 19   ;;  %s3134_s14 = smov 17   ;;  %v3136_v9 = vmov 0   ;;  %v51_v20 = vlaneseq  ;;  %vm121_vm1 = vcmask 1043456   ;;  %vm117_vm4 = vcmask 195584   ;;  %s4793_s0 = inlined_call_operand.vmem [shape: f32[1,8,768], index: 0, kind: input, shape index: {}]   ;;  %s4794_s2 = inlined_call_operand.vmem [shape: bf16[3,16,24], index: 2, kind: input, shape index: {}]   ;;  %s4795_s3 = inlined_call_operand.vmem [shape: f32[16,1], index: 3, kind: input, shape index: {}]   ;;  %s4796_s1 = inlined_call_operand.vmem [shape: f32[1,768], index: 1, kind: input, shape index: {}]   ;;  %s4797_s4 = inlined_call_operand.vmem [shape: bf16[3,16,48], index: 4, kind: input, shape index: {}]   ;;  %s4798_s5 = inlined_call_operand.vmem [shape: f32[16,1], index: 5, kind: input, shape index: {}]   ;;  %s4799_s7 = inlined_call_operand.vmem [shape: f32[8,1], index: 7, kind: input, shape index: {}]   ;;  %s4800_s6 = inlined_call_operand.vmem [shape: bf16[3,8,48], index: 6, kind: input, shape index: {}]   ;;  %s4801_s8 = inlined_call_operand.vmem [shape: f32[1,8,768], index: 8, kind: output, shape index: {}]  }
   0x1   :  { %v3190_v0 = vld [vmem:[%s4793_s0] sm:$0xff]  ;;  %v3195_v1 = vld [vmem:[%s4793_s0 + $0x8] sm:$0xff]  ;;  %v3200_v2 = vld [vmem:[%s4793_s0 + $0x18] sm:$0xff]  ;;  %s3135_s17 = smov 18   ;;  %172 = vmatprep.mubr.bf16.mxu0 %v3136_v9  ;;  %215 = vmatprep.mubr.bf16.mxu1 %v3136_v9  ;;  %s3138_s20 = smov 1   ;;  %vm940_vm10 = vcmask 392192  }
   0x2   :  { %v2531_v3 = vpack.i.bf16 %v3195_v1, %v3190_v0  ;;  %v3207_v4 = vld [vmem:[%s4793_s0 + $0x28] sm:$0xff]  ;;  %v3216_v6 = vld [vmem:[%s4793_s0 + $0x20] sm:$0xff]  ;;  %v3225_v8 = vld [vmem:[%s4793_s0 + $0x10] sm:$0xff]  ;;  %2622 = vset.pattern.permute.xlu1 %v3136_v9  ;;  %2621 = vset.pattern.permute.xlu0 %v3136_v9  ;;  %s3137_s0 = smov 127   ;;  %v2581_v15 = vpack.i.bf16 %v3190_v0, %v3195_v1  ;;  %s3139_s21 = smov 109   ;;  %v3286_v21 = vand.u32 127, %v51_v20 }
   0x3   :  { %v2526_v5 = vpack.i.bf16 %v3200_v2, %v3207_v4  ;;  %v2546_v7 = vpack.i.bf16 %v3216_v6, %v3207_v4  ;;  %v2556_v10 = vpack.i.bf16 %v3225_v8, %v3200_v2  ;;  %v2551_v11 = vpack.i.bf16 %v3225_v8, %v3216_v6  ;;  %s3140_s22 = smov 111   ;;  %s3141_s23 = smov 110   ;;  %v38_v18 = vld [vmem:[%s4795_s3 + $0x8] sm:$0xff]  ;;  %v37_v19 = vld [vmem:[%s4795_s3] sm:$0xff] }
   0x4   :  { %2532 = vrot.lane.b32.xlu1 %v2531_v3, %s3133_s13  ;;  %2522 = vrot.lane.b32.xlu0 %v2531_v3, %s3134_s14  ;;  %v2566_v12 = vpack.i.bf16 %v3200_v2, %v3225_v8  ;;  %v2571_v13 = vpack.i.bf16 %v3190_v0, %v3216_v6  ;;  %v2586_v14 = vpack.i.bf16 %v3207_v4, %v3195_v1  ;;  %vm91_vm0 = vcmp.lt.s32.totalorder %v3286_v21, 17  ;;  %v3320_v59 = vld [vmem:[%s4794_s2] sm:$0xff]  }
   0x5   :  { %v2596_v16 = vpack.i.bf16 %v3216_v6, %v3225_v8  ;;  %v2601_v17 = vpack.i.bf16 %v3225_v8, %v3195_v1  ;;  %vm72_vm2 = vcmp.lt.s32.totalorder %v3286_v21, 18  ;;  %vm53_vm3 = vcmp.lt.s32.totalorder %v3286_v21, 19 }
   0x6   :  { %vm322_vm5 = vcmp.lt.s32.totalorder %v3286_v21, 127  ;;  %vm303_vm6 = vcmp.lt.s32.totalorder %v3286_v21, 1  ;;  %vm561_vm7 = vcmp.lt.s32.totalorder %v3286_v21, 109  ;;  %vm523_vm8 = vcmp.lt.s32.totalorder %v3286_v21, 111 }
   0x7   :  { %vm542_vm9 = vcmp.lt.s32.totalorder %v3286_v21, 110  ;;  %vm2436_vm11 = vcmask 1040384   ;;  %vm2443_vm12 = vcmask 1041408  }
   0x8   :  { %2537 = vrot.lane.b32.xlu1 %v2531_v3, %s3135_s17  ;;  %2527 = vrot.lane.b32.xlu0 %v2526_v5, %s3134_s14 }
   0xc   :  { %2547 = vrot.lane.b32.xlu1 %v2546_v7, %s3135_s17  ;;  %2542 = vrot.lane.b32.xlu0 %v2546_v7, %s3133_s13 }
  0x10   :  { %2557 = vrot.lane.b32.xlu1 %v2556_v10, %s3133_s13  ;;  %2552 = vrot.lane.b32.xlu0 %v2551_v11, %s3134_s14 }
  0x14   :  { %2567 = vrot.lane.b32.xlu1 %v2566_v12, %s3137_s0  ;;  %2562 = vrot.lane.b32.xlu0 %v2556_v10, %s3135_s17 }
  0x18   :  { %2577 = vrot.lane.b32.xlu1 %v2566_v12, %s3138_s20  ;;  %2572 = vrot.lane.b32.xlu0 %v2571_v13, %s3137_s0 }
  0x1c   :  { %2587 = vrot.lane.b32.xlu1 %v2586_v14, %s3137_s0  ;;  %2582 = vrot.lane.b32.xlu0 %v2581_v15, %s3138_s20 }
  0x20   :  { %2597 = vrot.lane.b32.xlu1 %v2596_v16, %s3139_s21  ;;  %2592 = vrot.lane.b32.xlu0 %v2531_v3, %s3139_s21 }
  0x24   :  { %2602 = vrot.lane.b32.xlu1 %v2601_v17, %s3140_s22  ;;  %301 = vrot.lane.b32.xlu0 %v3207_v4, %s3138_s20 }
  0x28   :  { %511 = vrot.lane.b32.xlu1 %v3190_v0, %s3140_s22  ;;  %2607 = vrot.lane.b32.xlu0 %v2601_v17, %s3141_s23 }
  0x2c   :  { %559 = vrot.lane.b32.xlu1 %v3207_v4, %s3139_s21  ;;  %530 = vrot.lane.b32.xlu0 %v3190_v0, %s3141_s23 }
  0x30   :  { %2612 = vrot.lane.b32.xlu1 %v2546_v7, %s3140_s22  ;;  %299 = vrot.lane.b32.xlu0 %v3216_v6, %s3138_s20 }
  0x34   :  { %555 = vrot.lane.b32.xlu1 %v3200_v2, %s3139_s21  ;;  %2617 = vrot.lane.b32.xlu0 %v2546_v7, %s3141_s23 }
  0x38   :  { %536 = vrot.lane.b32.xlu1 %v3200_v2, %s3141_s23  ;;  %517 = vrot.lane.b32.xlu0 %v3200_v2, %s3140_s22 }
  0x3c   :  { %276 = vperm.xlu1 %2622, %v38_v18   ;;  %271 = vperm.xlu0 %2621, %v37_v19  }
  0x76   :  { %v3288_v22 = vpop.permute.xlu1 %2532  ;;  %v2523_v23 = vpop.permute.xlu0 %2522 }
  0x77   :  { %v2525_v24 = vunpack.i.h.bf16 %v2523_v23  ;;  %v2524_v25 = vunpack.i.l.bf16 %v2523_v23  ;;  %v2535_v27 = vunpack.i.h.bf16 %v3288_v22  ;;  %v2534_v28 = vunpack.i.l.bf16 %v3288_v22 }
  0x79   :  { %v96_v26 = vsel %vm91_vm0, %v2524_v25, %v2525_v24  ;;  %v58_v40 = vsel %vm53_vm3, %v2534_v28, %v2535_v27 }
  0x7a   :  { %v3295_v29 = vpop.permute.xlu1 %2537  ;;  %v2528_v30 = vpop.permute.xlu0 %2527  ;;  %v105_v31 = vpack.c.bf16 %v96_v26, %v96_v26 }
  0x7b   :  { %v2540_v32 = vunpack.i.h.bf16 %v3295_v29  ;;  %v2539_v33 = vunpack.i.l.bf16 %v3295_v29  ;;  %v2529_v34 = vunpack.i.l.bf16 %v2528_v30  ;;  %v2530_v54 = vunpack.i.h.bf16 %v2528_v30 }
  0x7c   :  { %2461 = vmatprep.subr.msk.bf16.mxu0 %vm121_vm1, %v105_v31 }
  0x7d   :  { %v97_v35 = vsel %vm91_vm0, %v2529_v34, %v2524_v25  ;;  %v77_v36 = vsel %vm72_vm2, %v2539_v33, %v2540_v32 }
  0x7e   :  { %v2548_v37 = vpop.permute.xlu1 %2547  ;;  %v2543_v38 = vpop.permute.xlu0 %2542  ;;  %v104_v39 = vpack.c.bf16 %v97_v35, %v97_v35  ;;  %v99_v46 = vpack.c.bf16 %v77_v36, %v58_v40 }
  0x7f   :  { %v2550_v41 = vunpack.i.h.bf16 %v2548_v37  ;;  %v2549_v42 = vunpack.i.l.bf16 %v2548_v37  ;;  %v2545_v43 = vunpack.i.h.bf16 %v2543_v38  ;;  %v2544_v44 = vunpack.i.l.bf16 %v2543_v38 }
  0x80   :  { %v123_v45 = vsel %vm121_vm1, %v104_v39, 0 }
  0x81   :  { %153 = vmatpush1.bf16.msra.mxu0 %v123_v45  ;;  %v59_v47 = vsel %vm53_vm3, %v2544_v44, %v2534_v28  ;;  %v78_v48 = vsel %vm72_vm2, %v2549_v42, %v2539_v33  ;;  %v54_v52 = vsel %vm53_vm3, %v2545_v43, %v2544_v44  ;;  %v73_v53 = vsel %vm72_vm2, %v2550_v41, %v2549_v42 }
  0x82   :  { %v2558_v49 = vpop.permute.xlu1 %2557  ;;  %v2553_v50 = vpop.permute.xlu0 %2552  ;;  %154 = vmatprep.subr.bf16.mxu0 %v99_v46  ;;  %v98_v51 = vpack.c.bf16 %v78_v48, %v59_v47  ;;  %v103_v63 = vpack.c.bf16 %v73_v53, %v54_v52 }
  0x83   :  { %v2555_v55 = vunpack.i.h.bf16 %v2553_v50  ;;  %v2554_v56 = vunpack.i.l.bf16 %v2553_v50  ;;  %v2560_v57 = vunpack.i.h.bf16 %v2558_v49  ;;  %v2559_v58 = vunpack.i.l.bf16 %v2558_v49 }
  0x85   :  { %155 = vmatpush1.bf16.msra.mxu0 %v98_v51  ;;  %v94_v60 = vsel %vm91_vm0, %v2555_v55, %v2530_v54  ;;  %v92_v61 = vsel %vm91_vm0, %v2554_v56, %v2529_v34  ;;  %v95_v62 = vsel %vm91_vm0, %v2525_v24, %v2555_v55  ;;  %v93_v12 = vsel %vm91_vm0, %v2530_v54, %v2554_v56 }
  0x86   :  { %v2568_v3 = vpop.permute.xlu1 %2567  ;;  %v2563_v5 = vpop.permute.xlu0 %2562  ;;  %v107_v7 = vpack.c.bf16 %v94_v60, %v94_v60  ;;  %v109_v10 = vpack.c.bf16 %v92_v61, %v92_v61  ;;  %v106_v11 = vpack.c.bf16 %v95_v62, %v95_v62  ;;  %v108_v18 = vpack.c.bf16 %v93_v12, %v93_v12 }
  0x87   :  { %v2570_v13 = vunpack.i.h.bf16 %v2568_v3  ;;  %v2569_v14 = vunpack.i.l.bf16 %v2568_v3  ;;  %v2565_v15 = vunpack.i.h.bf16 %v2563_v5  ;;  %v2564_v16 = vunpack.i.l.bf16 %v2563_v5 }
  0x88   :  { %2462 = vmatmul.mubr.msk.bf16.vlgmr.msra.gmra.mxu0 %vm117_vm4, %v3320_v59  ;;  %2463 = vmatprep.subr.msk.bf16.mxu1 %vm121_vm1, %v107_v7  ;;  %v129_v17 = vsel %vm121_vm1, %v106_v11, 0  ;;  %v56_v19 = vsel %vm53_vm3, %v2560_v57, %v2559_v58  ;;  %v57_v22 = vsel %vm53_vm3, %v2535_v27, %v2560_v57  ;;  %v55_v26 = vsel %vm53_vm3, %v2559_v58, %v2545_v43  ;;  %v3399_v7 = vld [vmem:[%s4794_s2 + $0x8] sm:$0xff]  }
  0x89   :  { %v74_v23 = vsel %vm72_vm2, %v2564_v16, %v2550_v41  ;;  %2465 = vmatprep.subr.msk.bf16.mxu0 %vm121_vm1, %v109_v10  ;;  %196 = vmatpush1.bf16.msra.mxu1 %v129_v17  ;;  %v75_v24 = vsel %vm72_vm2, %v2565_v15, %v2564_v16  ;;  %v76_v25 = vsel %vm72_vm2, %v2540_v32, %v2565_v15  ;;  %v135_v28 = vsel %vm121_vm1, %v108_v18, 0 }
  0x8a   :  { %v3350_v27 = vpop.permute.xlu1 %2577  ;;  %v2573_v29 = vpop.permute.xlu0 %2572  ;;  %v101_v30 = vpack.c.bf16 %v75_v24, %v56_v19  ;;  %v100_v31 = vpack.c.bf16 %v76_v25, %v57_v22  ;;  %258 = vmatprep.mubr.bf16.mxu0 %v3136_v9  ;;  %239 = vmatpush1.bf16.msra.mxu0 %v135_v28  ;;  %v102_v35 = vpack.c.bf16 %v74_v23, %v55_v26 }
  0x8b   :  { %v2580_v33 = vunpack.i.h.bf16 %v3350_v27  ;;  %v2579_v34 = vunpack.i.l.bf16 %v3350_v27  ;;  %v2574_v32 = vunpack.i.l.bf16 %v2573_v29  ;;  %240 = vmatprep.subr.bf16.mxu0 %v103_v63  ;;  %v325_v36 = vsel %vm322_vm5, %v2569_v14, %v2570_v13 }
  0x8c   :  { %197 = vmatprep.subr.bf16.mxu1 %v101_v30  ;;  %v337_v42 = vpack.c.bf16 %v325_v36, %v325_v36  ;;  %v2575_v43 = vunpack.i.h.bf16 %v2573_v29 }
  0x8d   :  { %198 = vmatpush1.bf16.msra.mxu1 %v100_v31  ;;  %v324_v37 = vsel %vm322_vm5, %v2570_v13, %v2574_v32  ;;  %v306_v38 = vsel %vm303_vm6, %v2579_v34, %v2580_v33 }
  0x8e   :  { %v2588_v39 = vpop.permute.xlu1 %2587  ;;  %v2583_v40 = vpop.permute.xlu0 %2582  ;;  %v338_v41 = vpack.c.bf16 %v324_v37, %v324_v37  ;;  %241 = vmatpush1.bf16.msra.mxu0 %v102_v35  ;;  %v332_v47 = vpack.c.bf16 %v3200_v2, %v306_v38  ;;  %v359_v52 = vsel %vm121_vm1, %v337_v42, 0 }
  0x8f   :  { %v2589_v44 = vunpack.i.l.bf16 %v2588_v39  ;;  %v2585_v45 = vunpack.i.h.bf16 %v2583_v40  ;;  %v2584_v46 = vunpack.i.l.bf16 %v2583_v40  ;;  %v2590_v2 = vunpack.i.h.bf16 %v2588_v39 }
  0x90   :  { %2472 = vmatprep.subr.msk.bf16.mxu0 %vm121_vm1, %v338_v41  ;;  %2464 = vmatmul.mubr.msk.bf16.vlgmr.msra.gmra.mxu1 %vm117_vm4, %v3320_v59  ;;  %v3105_v41 = vld [vmem:[%s4794_s2 + $0x10] sm:$0xff]  }
  0x91   :  { %v307_v48 = vsel %vm303_vm6, %v2584_v46, %v2579_v34  ;;  %v326_v49 = vsel %vm322_vm5, %v2589_v44, %v2569_v14  ;;  %v327_v50 = vsel %vm322_vm5, %v2575_v43, %v2589_v44  ;;  %v308_v51 = vsel %vm303_vm6, %v2585_v45, %v2584_v46  ;;  %402 = vmatprep.mubr.bf16.mxu1 %v3136_v9 }
  0x92   :  { %2466 = vmatmul.mubr.msk.bf16.vlgmr.msra.gmra.mxu0 %vm117_vm4, %v3320_v59  ;;  %v3380_v53 = vpop.permute.xlu1 %2597  ;;  %v2593_v54 = vpop.permute.xlu0 %2592  ;;  %v336_v55 = vpack.c.bf16 %v326_v49, %v326_v49  ;;  %v335_v56 = vpack.c.bf16 %v327_v50, %v327_v50  ;;  %v331_v61 = vpack.c.bf16 %v3225_v8, %v307_v48  ;;  %v330_v62 = vpack.c.bf16 %v3195_v1, %v308_v51 }
  0x93   :  { %426 = vmatpush1.bf16.msra.mxu0 %v359_v52  ;;  %v2599_v57 = vunpack.i.l.bf16 %v3380_v53  ;;  %v2595_v58 = vunpack.i.h.bf16 %v2593_v54  ;;  %v2594_v60 = vunpack.i.l.bf16 %v2593_v54  ;;  %445 = vmatprep.mubr.bf16.mxu0 %v3136_v9  ;;  %v328_v11 = vsel %vm322_vm5, %v2590_v2, %v2575_v43 }
  0x94   :  { %427 = vmatprep.subr.bf16.mxu0 %v332_v47  ;;  %2470 = vmatprep.subr.msk.bf16.mxu1 %vm121_vm1, %v336_v55  ;;  %v353_v59 = vsel %vm121_vm1, %v335_v56, 0  ;;  %v323_v12 = vsel %vm322_vm5, %v2574_v32, %v2590_v2  ;;  %v340_v18 = vpack.c.bf16 %v328_v11, %v328_v11  ;;  %v2600_v25 = vunpack.i.h.bf16 %v3380_v53 }
  0x95   :  { %383 = vmatpush1.bf16.msra.mxu1 %v353_v59  ;;  %v565_v63 = vsel %vm561_vm7, %v2595_v58, %v2599_v57  ;;  %v566_v3 = vsel %vm561_vm7, %v2594_v60, %v2595_v58  ;;  %v339_v19 = vpack.c.bf16 %v323_v12, %v323_v12 }
  0x96   :  { %v3394_v5 = vpop.permute.xlu1 %2602  ;;  %v302_v8 = vpop.permute.xlu0 %301  ;;  %384 = vmatprep.subr.bf16.mxu1 %v330_v62  ;;  %v575_v10 = vpack.c.bf16 %v565_v63, %v565_v63  ;;  %v574_v1 = vpack.c.bf16 %v566_v3, %v566_v3 }
  0x97   :  { %428 = vmatpush1.bf16.msra.mxu0 %v331_v61  ;;  %v309_v13 = vsel %vm303_vm6, %v302_v8, %v2585_v45  ;;  %v2605_v16 = vunpack.i.h.bf16 %v3394_v5  ;;  %v2604_v17 = vunpack.i.l.bf16 %v3394_v5  ;;  %v365_v26 = vsel %vm121_vm1, %v339_v19, 0 }
  0x98   :  { %v329_v14 = vpack.c.bf16 %v3190_v0, %v309_v13  ;;  %2479 = vmatprep.subr.msk.bf16.mxu0 %vm121_vm1, %v575_v10  ;;  %v592_v15 = vsel %vm121_vm1, %v574_v1, 0 }
  0x99   :  { %v527_v28 = vsel %vm523_vm8, %v2604_v17, %v2605_v16 }
  0x9a   :  { %2473 = vmatmul.mubr.msk.bf16.vlgmr.msra.gmra.mxu0 %vm117_vm4, %v3399_v7  ;;  %v512_v22 = vpop.permute.xlu1 %511  ;;  %v3415_v23 = vpop.permute.xlu0 %2607  ;;  %385 = vmatpush1.bf16.msra.mxu1 %v329_v14 }
  0x9b   :  { %622 = vmatpush1.bf16.msra.mxu0 %v592_v15  ;;  %v2610_v0 = vunpack.i.h.bf16 %v3415_v23  ;;  %v2609_v24 = vunpack.i.l.bf16 %v3415_v23  ;;  %2474 = vmatprep.subr.msk.bf16.mxu1 %vm121_vm1, %v340_v18  ;;  %v528_v32 = vsel %vm523_vm8, %v512_v22, %v2604_v17 }
  0x9c   :  { %641 = vmatprep.mubr.bf16.mxu0 %v3136_v9 }
  0x9d   :  { %2471 = vmatmul.mubr.msk.bf16.vlgmr.msra.gmra.mxu1 %vm117_vm4, %v3399_v7  ;;  %v546_v29 = vsel %vm542_vm9, %v2609_v24, %v2610_v0 }
  0x9e   :  { %v560_v30 = vpop.permute.xlu1 %559  ;;  %v531_v31 = vpop.permute.xlu0 %530  ;;  %469 = vmatpush1.bf16.msra.mxu1 %v365_v26  ;;  %v569_v34 = vpack.c.bf16 %v546_v29, %v527_v28  ;;  %488 = vmatprep.mubr.bf16.mxu1 %v3136_v9 }
  0x9f   :  { %v562_v35 = vsel %vm561_vm7, %v2600_v25, %v560_v30  ;;  %v567_v36 = vsel %vm561_vm7, %v560_v30, %v2594_v60  ;;  %v547_v37 = vsel %vm542_vm9, %v531_v31, %v2609_v24  ;;  %v3500_v30 = vshrl.u32 %v51_v20, 7 }
  0xa0   :  { %v579_v38 = vpack.c.bf16 %v567_v36, %v567_v36  ;;  %v568_v39 = vpack.c.bf16 %v547_v37, %v528_v32  ;;  %623 = vmatprep.subr.bf16.mxu0 %v569_v34  ;;  %v578_v40 = vpack.c.bf16 %v562_v35, %v562_v35 }
  0xa2   :  { %v2613_v42 = vpop.permute.xlu1 %2612  ;;  %v300_v43 = vpop.permute.xlu0 %299  ;;  %624 = vmatpush1.bf16.msra.mxu0 %v568_v39  ;;  %v604_v50 = vsel %vm121_vm1, %v578_v40, 0  ;;  %v3506_v40 = vld [vmem:[%s4796_s1] sm:$0x3f] }
  0xa3   :  { %v304_v44 = vsel %vm303_vm6, %v300_v43, %v302_v8  ;;  %v305_v45 = vsel %vm303_vm6, %v2580_v33, %v300_v43  ;;  %2483 = vmatprep.subr.msk.bf16.mxu0 %vm121_vm1, %v579_v38  ;;  %v2615_v48 = vunpack.i.h.bf16 %v2613_v42  ;;  %v2614_v49 = vunpack.i.l.bf16 %v2613_v42 }
  0xa4   :  { %v333_v46 = vpack.c.bf16 %v3216_v6, %v305_v45  ;;  %v334_v47 = vpack.c.bf16 %v3207_v4, %v304_v44  ;;  %v765_v38 = vsub.s32 0, %v3500_v30 }
  0xa5   :  { %2480 = vmatmul.mubr.msk.bf16.vlgmr.msra.gmra.mxu0 %vm117_vm4, %v3105_v41  ;;  %v524_v55 = vsel %vm523_vm8, %v2615_v48, %v2614_v49  ;;  %v529_v58 = vsel %vm523_vm8, %v2614_v49, %v512_v22 }
  0xa6   :  { %v556_v51 = vpop.permute.xlu1 %555  ;;  %v2618_v2 = vpop.permute.xlu0 %2617  ;;  %470 = vmatprep.subr.bf16.mxu1 %v334_v47  ;;  %708 = vmatpush1.bf16.msra.mxu0 %v604_v50  ;;  %v3509_v45 = vrot.slane %v3506_v40, %v765_v38 }
  0xa7   :  { %v563_v27 = vsel %vm561_vm7, %v556_v51, %v2600_v25  ;;  %v564_v6 = vsel %vm561_vm7, %v2599_v57, %v556_v51  ;;  %v2620_v33 = vunpack.i.h.bf16 %v2618_v2  ;;  %v2619_v4 = vunpack.i.l.bf16 %v2618_v2  ;;  %471 = vmatpush1.bf16.msra.mxu1 %v333_v46  ;;  %727 = vmatprep.mubr.bf16.mxu0 %v3136_v9 }
  0xa8   :  { %v576_v52 = vpack.c.bf16 %v564_v6, %v564_v6  ;;  %v577_v54 = vpack.c.bf16 %v563_v27, %v563_v27  ;;  %v769_v6 = vsub.s32 1, %v3500_v30 }
  0xa9   :  { %v543_v56 = vsel %vm542_vm9, %v2620_v33, %v2619_v4  ;;  %v548_v53 = vsel %vm542_vm9, %v2619_v4, %v531_v31 }
  0xaa   :  { %v537_v57 = vpop.permute.xlu1 %536  ;;  %v518_v60 = vpop.permute.xlu0 %517  ;;  %2475 = vmatmul.mubr.msk.bf16.vlgmr.msra.gmra.mxu1 %vm117_vm4, %v3399_v7  ;;  %2481 = vmatprep.subr.msk.bf16.mxu1 %vm121_vm1, %v577_v54  ;;  %v598_v61 = vsel %vm121_vm1, %v576_v52, 0  ;;  %v573_v59 = vpack.c.bf16 %v548_v53, %v529_v58  ;;  %v572_v62 = vpack.c.bf16 %v543_v56, %v524_v55 }
  0xab   :  { %v544_v63 = vsel %vm542_vm9, %v537_v57, %v2620_v33  ;;  %v545_v3 = vsel %vm542_vm9, %v2610_v0, %v537_v57  ;;  %v525_v8 = vsel %vm523_vm8, %v518_v60, %v2615_v48  ;;  %v526_v7 = vsel %vm523_vm8, %v2605_v16, %v518_v60  ;;  %665 = vmatpush1.bf16.msra.mxu1 %v598_v61 }
  0xac   :  { %v570_v10 = vpack.c.bf16 %v545_v3, %v526_v7  ;;  %709 = vmatprep.subr.bf16.mxu0 %v573_v59  ;;  %v571_v1 = vpack.c.bf16 %v544_v63, %v525_v8  ;;  %684 = vmatprep.mubr.bf16.mxu1 %v3136_v9  ;;  %v773_v57 = vsub.s32 2, %v3500_v30  ;;  %v3520_v60 = vrot.slane %v3506_v40, %v769_v6 }
  0xad   :  { %710 = vmatpush1.bf16.msra.mxu0 %v572_v62 }
  0xae   :  { %666 = vmatprep.subr.bf16.mxu1 %v571_v1 }
  0xaf   :  { %667 = vmatpush1.bf16.msra.mxu1 %v570_v10  ;;  %v781_v10 = vsub.s32 4, %v3500_v30 }
  0xb0   :  { %2484 = vmatmul.mubr.msk.bf16.vlgmr.msra.gmra.mxu0 %vm117_vm4, %v3105_v41 }
  0xb1   :  { %1019 = vmatprep.mubr.bf16.mxu0 %v3136_v9 }
  0xb2   :  { %2482 = vmatmul.mubr.msk.bf16.vlgmr.msra.gmra.mxu1 %vm117_vm4, %v3105_v41 }
  0xb3   :  { %976 = vmatprep.mubr.bf16.mxu1 %v3136_v9 }
  0xb7   :  { %v272_v26 = vpop.permute.xlu0 %271  ;;  %v277_v31 = vpop.permute.xlu1 %276 }
 0x148   :  { %v174_v5 = vpop.f32.mrf.mxu0 }
 0x149   :  { %v279_v34 = vadd.f32 %v272_v26, %v174_v5 }
 0x14a   :  { %v176_v11 = vpop.f32.mrf.mxu0 }
 0x14b   :  { %v280_v47 = vadd.f32 %v272_v26, %v176_v11 }
 0x14c   :  { %v178_v12 = vpop.f32.mrf.mxu0 }
 0x14d   :  { %v285_v39 = vadd.f32 %v277_v31, %v178_v12  ;;  %v3528_v12 = vrot.slane %v3506_v40, %v773_v57 }
 0x14e   :  { %v180_v13 = vpop.f32.mrf.mxu0 }
 0x14f   :  { %v286_v20 = vadd.f32 %v277_v31, %v180_v13 }
 0x150   :  { %v217_v14 = vpop.f32.mrf.mxu1 }
 0x151   :  { %v281_v54 = vadd.f32 %v272_v26, %v217_v14  ;;  %v777_v14 = vsub.s32 3, %v3500_v30 }
 0x152   :  { %v260_v15 = vpop.f32.mrf.mxu0  ;;  %v219_v16 = vpop.f32.mrf.mxu1 }
 0x153   :  { %v282_v3 = vadd.f32 %v272_v26, %v219_v16  ;;  %v283_v5 = vadd.f32 %v272_v26, %v260_v15 }
 0x154   :  { %v3489_v17 = vpop.f32.mrf.mxu0  ;;  %v221_v18 = vpop.f32.mrf.mxu1 }
 0x155   :  { %v287_v7 = vadd.f32 %v277_v31, %v221_v18  ;;  %v284_v18 = vadd.f32 %v272_v26, %v3489_v17 }
 0x156   :  { %v3491_v19 = vpop.f32.mrf.mxu0  ;;  %v223_v23 = vpop.f32.mrf.mxu1 }
 0x157   :  { %v288_v16 = vadd.f32 %v277_v31, %v223_v23 }
 0x158   :  { %v3493_v22 = vpop.f32.mrf.mxu0 }
 0x15a   :  { %v447_v0 = vpop.f32.mrf.mxu0 }
 0x15b   :  { %v501_v8 = vadd.f32 %v447_v0, %v281_v54  ;;  %v289_v0 = vadd.f32 %v277_v31, %v3491_v19 }
 0x15c   :  { %v3495_v24 = vpop.f32.mrf.mxu0 }
 0x15d   :  { %v404_v25 = vpop.f32.mrf.mxu1 }
 0x15e   :  { %v3497_v28 = vpop.f32.mrf.mxu0  ;;  %v499_v36 = vadd.f32 %v404_v25, %v279_v34 }
 0x15f   :  { %v406_v29 = vpop.f32.mrf.mxu1 }
 0x160   :  { %v453_v32 = vpop.f32.mrf.mxu0  ;;  %v500_v27 = vadd.f32 %v406_v29, %v280_v47  ;;  %v290_v29 = vadd.f32 %v277_v31, %v3493_v22 }
 0x161   :  { %v408_v35 = vpop.f32.mrf.mxu1  ;;  %v508_v38 = vadd.f32 %v453_v32, %v288_v16 }
 0x162   :  { %v505_v44 = vadd.f32 %v408_v35, %v285_v39 }
 0x163   :  { %v410_v42 = vpop.f32.mrf.mxu1 }
 0x164   :  { %v506_v48 = vadd.f32 %v410_v42, %v286_v20 }
 0x165   :  { %v643_v37 = vpop.f32.mrf.mxu0 }
 0x166   :  { %v738_v41 = vadd.f32 %v643_v37, %v499_v36  ;;  %v502_v36 = vadd.f32 %v3495_v24, %v282_v3  ;;  %v507_v37 = vadd.f32 %v3497_v28, %v287_v7 }
 0x167   :  { %v645_v43 = vpop.f32.mrf.mxu0 }
 0x168   :  { %v750_v49 = vmax.f32 %v738_v41, 0.0  ;;  %v739_v56 = vadd.f32 %v645_v43, %v500_v27 }
 0x169   :  { %v647_v46 = vpop.f32.mrf.mxu0 }
 0x16a   :  { %v744_v50 = vadd.f32 %v647_v46, %v505_v44  ;;  %v490_v51 = vpop.f32.mrf.mxu1  ;;  %v3513_v55 = vmul.f32 %v3509_v45, %v750_v49  ;;  %v751_v1 = vmax.f32 %v739_v56, 0.0 }
 0x16b   :  { %v649_v2 = vpop.f32.mrf.mxu0  ;;  %v503_v17 = vadd.f32 %v490_v51, %v283_v5 }
 0x16c   :  { %v756_v33 = vmax.f32 %v744_v50, 0.0  ;;  %v745_v4 = vadd.f32 %v649_v2, %v506_v48  ;;  %v492_v52 = vpop.f32.mrf.mxu1  ;;  %v3544_v23 = vmul.f32 %v3520_v60, %v751_v1  ;;  %v785_v50 = vsub.s32 5, %v3500_v30 }
 0x16d   :  { %v504_v43 = vadd.f32 %v492_v52, %v284_v18  ;;  %v3563_v52 = vrot.slane %v3506_v40, %v777_v14  ;;  %v806_v18 = vld [vmem:[%s4798_s5 + $0x8] sm:$0xff] }
 0x16e   :  { %v3516_v58 = vmul.f32 %v3509_v45, %v756_v33  ;;  %v494_v53 = vpop.f32.mrf.mxu1  ;;  %v757_v61 = vmax.f32 %v745_v4, 0.0  ;;  %v3560_v4 = vrot.slane %v3506_v40, %v781_v10  ;;  %v3568_v57 = vrot.slane %v3506_v40, %v785_v50 }
 0x16f   :  { %v509_v39 = vadd.f32 %v494_v53, %v289_v0 }
 0x170   :  { %v496_v59 = vpop.f32.mrf.mxu1  ;;  %v729_v62 = vpop.f32.mrf.mxu0  ;;  %v3524_v63 = vpack.i.bf16 %v3516_v58, %v3513_v55  ;;  %v3538_v15 = vmul.f32 %v3520_v60, %v757_v61 }
 0x171   :  { %v510_v41 = vadd.f32 %v496_v59, %v290_v29  ;;  %v742_v44 = vadd.f32 %v729_v62, %v503_v17 }
 0x172   :  { %v686_v11 = vpop.f32.mrf.mxu1  ;;  %2629 = vrot.lane.b32.xlu0 %v3524_v63, %s3135_s17  ;;  %2624 = vrot.lane.b32.xlu1 %v3524_v63, %s3134_s14  ;;  %v731_v13 = vpop.f32.mrf.mxu0  ;;  %v2653_v62 = vpack.i.bf16 %v3538_v15, %v3544_v23 }
 0x173   :  { %v740_v25 = vadd.f32 %v686_v11, %v501_v8  ;;  %v743_v49 = vadd.f32 %v731_v13, %v504_v43  ;;  %v754_v33 = vmax.f32 %v742_v44, 0.0 }
 0x174   :  { %v688_v34 = vpop.f32.mrf.mxu1  ;;  %v733_v35 = vpop.f32.mrf.mxu0 }
 0x175   :  { %v752_v42 = vmax.f32 %v740_v25, 0.0  ;;  %v748_v22 = vadd.f32 %v733_v35, %v509_v39  ;;  %v741_v20 = vadd.f32 %v688_v34, %v502_v36  ;;  %v755_v53 = vmax.f32 %v743_v49, 0.0 }
 0x176   :  { %v690_v26 = vpop.f32.mrf.mxu1  ;;  %2634 = vrot.lane.b32.xlu1 %v3524_v63, %s3133_s13  ;;  %v735_v19 = vpop.f32.mrf.mxu0  ;;  %v3581_v3 = vmul.f32 %v3560_v4, %v754_v33 }
 0x177   :  { %v746_v31 = vadd.f32 %v690_v26, %v507_v37  ;;  %v749_v47 = vadd.f32 %v735_v19, %v510_v41  ;;  %v3554_v51 = vmul.f32 %v3528_v12, %v752_v42  ;;  %v760_v2 = vmax.f32 %v748_v22, 0.0 }
 0x178   :  { %v692_v24 = vpop.f32.mrf.mxu1  ;;  %v753_v54 = vmax.f32 %v741_v20, 0.0  ;;  %v3590_v7 = vmul.f32 %v3568_v57, %v755_v53 }
 0x179   :  { %v758_v46 = vmax.f32 %v746_v31, 0.0  ;;  %v747_v48 = vadd.f32 %v692_v24, %v508_v38  ;;  %v761_v56 = vmax.f32 %v749_v47, 0.0  ;;  %v3571_v61 = vmul.f32 %v3560_v4, %v760_v2 }
 0x17a   :  { %v3584_v8 = vmul.f32 %v3563_v52, %v753_v54 }
 0x17b   :  { %v3557_v27 = vmul.f32 %v3528_v12, %v758_v46  ;;  %v759_v6 = vmax.f32 %v747_v48, 0.0  ;;  %v3587_v40 = vmul.f32 %v3568_v57, %v761_v56  ;;  %v2818_v1 = vpack.i.bf16 %v3571_v61, %v3581_v3 }
 0x17d   :  { %v2638_v30 = vpack.i.bf16 %v3557_v27, %v3554_v51  ;;  %v3574_v59 = vmul.f32 %v3563_v52, %v759_v6  ;;  %v2703_v16 = vpack.i.bf16 %v3587_v40, %v3590_v7 }
 0x17f   :  { %2639 = vrot.lane.b32.xlu0 %v2638_v30, %s3134_s14  ;;  %2644 = vrot.lane.b32.xlu1 %v2638_v30, %s3137_s0  ;;  %v2663_v10 = vpack.i.bf16 %v3574_v59, %v3584_v8 }
 0x183   :  { %2654 = vrot.lane.b32.xlu1 %v2653_v62, %s3135_s17  ;;  %2649 = vrot.lane.b32.xlu0 %v2653_v62, %s3134_s14 }
 0x187   :  { %2659 = vrot.lane.b32.xlu0 %v2653_v62, %s3133_s13  ;;  %2664 = vrot.lane.b32.xlu1 %v2663_v10, %s3134_s14 }
 0x18b   :  { %2684 = vrot.lane.b32.xlu0 %v2818_v1, %s3134_s14  ;;  %2669 = vrot.lane.b32.xlu1 %v2663_v10, %s3135_s17 }
 0x18f   :  { %2689 = vrot.lane.b32.xlu0 %v2818_v1, %s3135_s17  ;;  %2674 = vrot.lane.b32.xlu1 %v2663_v10, %s3133_s13 }
 0x193   :  { %2694 = vrot.lane.b32.xlu0 %v2818_v1, %s3133_s13  ;;  %2679 = vrot.lane.b32.xlu1 %v2663_v10, %s3137_s0 }
 0x197   :  { %2699 = vrot.lane.b32.xlu0 %v2818_v1, %s3137_s0  ;;  %2704 = vrot.lane.b32.xlu1 %v2703_v16, %s3134_s14 }
 0x19b   :  { %2709 = vrot.lane.b32.xlu0 %v2703_v16, %s3135_s17  ;;  %2719 = vrot.lane.b32.xlu1 %v2638_v30, %s3133_s13 }
 0x19f   :  { %2714 = vrot.lane.b32.xlu0 %v2638_v30, %s3135_s17  ;;  %2729 = vrot.lane.b32.xlu1 %v2703_v16, %s3133_s13 }
 0x1a3   :  { %2724 = vrot.lane.b32.xlu0 %v2638_v30, %s3138_s20  ;;  %2734 = vrot.lane.b32.xlu1 %v2663_v10, %s3138_s20 }
 0x1a7   :  { %2739 = vrot.lane.b32.xlu0 %v2653_v62, %s3138_s20  ;;  %2744 = vrot.lane.b32.xlu1 %v2653_v62, %s3137_s0 }
 0x1ab   :  { %2749 = vrot.lane.b32.xlu0 %v3524_v63, %s3137_s0  ;;  %2754 = vrot.lane.b32.xlu1 %v2653_v62, %s3139_s21 }
 0x1af   :  { %2759 = vrot.lane.b32.xlu0 %v2638_v30, %s3139_s21  ;;  %2764 = vrot.lane.b32.xlu1 %v3524_v63, %s3139_s21 }
 0x1b3   :  { %2769 = vrot.lane.b32.xlu0 %v2653_v62, %s3141_s23  ;;  %2774 = vrot.lane.b32.xlu1 %v2638_v30, %s3141_s23 }
 0x1b7   :  { %2779 = vrot.lane.b32.xlu0 %v3524_v63, %s3141_s23  ;;  %2784 = vrot.lane.b32.xlu1 %v3524_v63, %s3138_s20 }
 0x1bb   :  { %2794 = vrot.lane.b32.xlu0 %v2638_v30, %s3140_s22  ;;  %2789 = vrot.lane.b32.xlu1 %v2653_v62, %s3140_s22 }
 0x1bf   :  { %2804 = vrot.lane.b32.xlu0 %v2703_v16, %s3138_s20  ;;  %2799 = vrot.lane.b32.xlu1 %v3524_v63, %s3140_s22  ;;  %v805_v63 = vld [vmem:[%s4798_s5] sm:$0xff] }
 0x1c3   :  { %2809 = vrot.lane.b32.xlu0 %v2703_v16, %s3137_s0  ;;  %2824 = vrot.lane.b32.xlu1 %v2703_v16, %s3139_s21 }
 0x1c7   :  { %2814 = vrot.lane.b32.xlu0 %v2818_v1, %s3139_s21  ;;  %2829 = vrot.lane.b32.xlu1 %v2703_v16, %s3141_s23 }
 0x1cb   :  { %2819 = vrot.lane.b32.xlu0 %v2818_v1, %s3141_s23  ;;  %2834 = vrot.lane.b32.xlu1 %v2818_v1, %s3138_s20 }
 0x1cf   :  { %2844 = vrot.lane.b32.xlu0 %v2703_v16, %s3140_s22  ;;  %2839 = vrot.lane.b32.xlu1 %v2818_v1, %s3140_s22 }
 0x1d3   :  { %2849 = vrot.lane.b32.xlu0 %v2663_v10, %s3139_s21  ;;  %2854 = vrot.lane.b32.xlu1 %v2663_v10, %s3141_s23 }
 0x1d7   :  { %2859 = vrot.lane.b32.xlu0 %v2663_v10, %s3140_s22  ;;  %1075 = vperm.xlu1 %2622, %v805_v63  }
 0x1db   :  { %1080 = vperm.xlu0 %2621, %v806_v18  }
 0x1e4   :  { %v2625_v0 = vpop.permute.xlu1 %2624  ;;  %v3660_v25 = vpop.permute.xlu0 %2629 }
 0x1e5   :  { %v2627_v38 = vunpack.i.h.bf16 %v2625_v0  ;;  %v2626_v39 = vunpack.i.l.bf16 %v2625_v0  ;;  %v2632_v63 = vunpack.i.h.bf16 %v3660_v25  ;;  %v2631_v18 = vunpack.i.l.bf16 %v3660_v25 }
 0x1e8   :  { %v3662_v29 = vpop.permute.xlu1 %2634 }
 0x1e9   :  { %v2636_v0 = vunpack.i.l.bf16 %v3662_v29 }
 0x1f1   :  { %v2640_v34 = vpop.permute.xlu0 %2639  ;;  %v3664_v35 = vpop.permute.xlu1 %2644 }
 0x1f2   :  { %v2642_v42 = vunpack.i.h.bf16 %v2640_v34  ;;  %v2641_v22 = vunpack.i.l.bf16 %v2640_v34 }
 0x1f5   :  { %v3666_v36 = vpop.permute.xlu1 %2654  ;;  %v2650_v37 = vpop.permute.xlu0 %2649 }
 0x1f6   :  { %v2652_v17 = vunpack.i.h.bf16 %v2650_v37  ;;  %v2651_v26 = vunpack.i.l.bf16 %v2650_v37  ;;  %v2657_v62 = vunpack.i.h.bf16 %v3666_v36  ;;  %v2656_v10 = vunpack.i.l.bf16 %v3666_v36 }
 0x1f8   :  { %v911_v19 = vsel %vm91_vm0, %v2626_v39, %v2651_v26  ;;  %v912_v41 = vsel %vm91_vm0, %v2627_v38, %v2652_v17  ;;  %v910_v46 = vsel %vm91_vm0, %v2652_v17, %v2642_v42  ;;  %v909_v47 = vsel %vm91_vm0, %v2651_v26, %v2641_v22 }
 0x1f9   :  { %v3672_v31 = vpop.permute.xlu0 %2659  ;;  %v2665_v43 = vpop.permute.xlu1 %2664  ;;  %v928_v44 = vpack.c.bf16 %v912_v41, %v911_v19  ;;  %v929_v33 = vpack.c.bf16 %v910_v46, %v909_v47  ;;  %v2637_v17 = vunpack.i.h.bf16 %v3662_v29  ;;  %v875_v36 = vsel %vm72_vm2, %v2631_v18, %v2656_v10 }
 0x1fa   :  { %v2667_v24 = vunpack.i.h.bf16 %v2665_v43  ;;  %v2666_v20 = vunpack.i.l.bf16 %v2665_v43  ;;  %v2661_v1 = vunpack.i.l.bf16 %v3672_v31  ;;  %v2662_v16 = vunpack.i.h.bf16 %v3672_v31 }
 0x1fb   :  { %954 = vmatprep.subr.bf16.mxu1 %v928_v44 }
 0x1fc   :  { %v907_v48 = vsel %vm91_vm0, %v2641_v22, %v2666_v20  ;;  %v908_v49 = vsel %vm91_vm0, %v2642_v42, %v2667_v24  ;;  %v876_v42 = vsel %vm72_vm2, %v2632_v63, %v2657_v62  ;;  %v839_v25 = vsel %vm53_vm3, %v2636_v0, %v2661_v1 }
 0x1fd   :  { %v3682_v50 = vpop.permute.xlu0 %2684  ;;  %v3684_v2 = vpop.permute.xlu1 %2669  ;;  %v930_v6 = vpack.c.bf16 %v908_v49, %v907_v48  ;;  %v840_v44 = vsel %vm53_vm3, %v2637_v17, %v2662_v16  ;;  %v2647_v49 = vunpack.i.h.bf16 %v3664_v35 }
 0x1fe   :  { %v2686_v41 = vunpack.i.l.bf16 %v3682_v50  ;;  %v2687_v22 = vunpack.i.h.bf16 %v3682_v50  ;;  %v916_v14 = vpack.c.bf16 %v840_v44, %v839_v25 }
 0x1ff   :  { %997 = vmatprep.subr.bf16.mxu0 %v930_v6 }
 0x200   :  { %998 = vmatpush1.bf16.msra.mxu0 %v929_v33  ;;  %v3725_v50 = vsel %vm91_vm0, %v2666_v20, %v2686_v41 }
 0x201   :  { %v3686_v54 = vpop.permute.xlu0 %2689  ;;  %v3688_v56 = vpop.permute.xlu1 %2674 }
 0x202   :  { %v2691_v20 = vunpack.i.l.bf16 %v3686_v54  ;;  %v2677_v32 = vunpack.i.h.bf16 %v3688_v56  ;;  %v2676_v28 = vunpack.i.l.bf16 %v3688_v56  ;;  %v2646_v56 = vunpack.i.l.bf16 %v3664_v35 }
 0x205   :  { %v3690_v30 = vpop.permute.xlu0 %2694  ;;  %v3692_v53 = vpop.permute.xlu1 %2679 }
 0x206   :  { %v2681_v31 = vunpack.i.l.bf16 %v3692_v53 }
 0x209   :  { %v3701_v34 = vpop.permute.xlu0 %2699  ;;  %v2705_v37 = vpop.permute.xlu1 %2704 }
 0x20a   :  { %v2707_v26 = vunpack.i.h.bf16 %v2705_v37  ;;  %v2706_v19 = vunpack.i.l.bf16 %v2705_v37  ;;  %v922_v37 = vpack.c.bf16 %v876_v42, %v875_v36 }
 0x20c   :  { %v914_v29 = vsel %vm91_vm0, %v2707_v26, %v2627_v38  ;;  %v913_v43 = vsel %vm91_vm0, %v2706_v19, %v2626_v39  ;;  %v2672_v38 = vunpack.i.h.bf16 %v3684_v2  ;;  %v2671_v39 = vunpack.i.l.bf16 %v3684_v2 }
 0x20d   :  { %v927_v46 = vpack.c.bf16 %v914_v29, %v913_v43  ;;  %v2710_v47 = vpop.permute.xlu0 %2709  ;;  %v2720_v48 = vpop.permute.xlu1 %2719  ;;  %v906_v29 = vsel %vm91_vm0, %v2667_v24, %v2687_v22  ;;  %v2692_v43 = vunpack.i.h.bf16 %v3686_v54  ;;  %v904_v54 = vsel %vm91_vm0, %v2687_v22, %v2707_v26 }
 0x20e   :  { %v2712_v6 = vunpack.i.h.bf16 %v2710_v47  ;;  %v2711_v33 = vunpack.i.l.bf16 %v2710_v47  ;;  %v2722_v13 = vunpack.i.h.bf16 %v2720_v48  ;;  %v2721_v2 = vunpack.i.l.bf16 %v2720_v48 }
 0x20f   :  { %955 = vmatpush1.bf16.msra.mxu1 %v927_v46 }
 0x210   :  { %v878_v47 = vsel %vm72_vm2, %v2712_v6, %v2632_v63  ;;  %v877_v36 = vsel %vm72_vm2, %v2711_v33, %v2631_v18  ;;  %956 = vmatprep.subr.bf16.mxu1 %v922_v37  ;;  %v903_v63 = vsel %vm91_vm0, %v2686_v41, %v2706_v19 }
 0x211   :  { %v921_v42 = vpack.c.bf16 %v878_v47, %v877_v36  ;;  %v2715_v46 = vpop.permute.xlu0 %2714  ;;  %v2730_v25 = vpop.permute.xlu1 %2729  ;;  %v932_v22 = vpack.c.bf16 %v904_v54, %v903_v63  ;;  %v870_v63 = vsel %vm72_vm2, %v2672_v38, %v2692_v43  ;;  %v2697_v54 = vunpack.i.h.bf16 %v3690_v30 }
 0x212   :  { %v2717_v44 = vunpack.i.h.bf16 %v2715_v46  ;;  %v2716_v11 = vunpack.i.l.bf16 %v2715_v46  ;;  %v2732_v5 = vunpack.i.h.bf16 %v2730_v25  ;;  %v2731_v24 = vunpack.i.l.bf16 %v2730_v25 }
 0x213   :  { %957 = vmatpush1.bf16.msra.mxu1 %v921_v42  ;;  %v931_v42 = vpack.c.bf16 %v906_v29, %v3725_v50  ;;  %v867_v46 = vsel %vm72_vm2, %v2691_v20, %v2711_v33  ;;  %v868_v25 = vsel %vm72_vm2, %v2692_v43, %v2712_v6  ;;  %v2701_v50 = vunpack.i.l.bf16 %v3701_v34 }
 0x214   :  { %v874_v18 = vsel %vm72_vm2, %v2657_v62, %v2717_v44  ;;  %v873_v48 = vsel %vm72_vm2, %v2656_v10, %v2716_v11  ;;  %v842_v37 = vsel %vm53_vm3, %v2732_v5, %v2637_v17  ;;  %v841_v47 = vsel %vm53_vm3, %v2731_v24, %v2636_v0  ;;  %958 = vmatprep.subr.bf16.mxu1 %v916_v14  ;;  %v3767_v0 = vld [vmem:[%s4797_s4] sm:$0xff]  }
 0x215   :  { %v915_v36 = vpack.c.bf16 %v842_v37, %v841_v47  ;;  %v3752_v19 = vpop.permute.xlu0 %2724  ;;  %v3754_v41 = vpop.permute.xlu1 %2734  ;;  %v871_v62 = vsel %vm72_vm2, %v2716_v11, %v2671_v39  ;;  %v872_v10 = vsel %vm72_vm2, %v2717_v44, %v2672_v38  ;;  %v923_v26 = vpack.c.bf16 %v874_v18, %v873_v48 }
 0x216   :  { %v835_v17 = vsel %vm53_vm3, %v2721_v2, %v2676_v28  ;;  %v836_v14 = vsel %vm53_vm3, %v2722_v13, %v2677_v32  ;;  %v924_v11 = vpack.c.bf16 %v872_v10, %v871_v62  ;;  %v869_v44 = vsel %vm72_vm2, %v2671_v39, %v2691_v20 }
 0x217   :  { %959 = vmatpush1.bf16.msra.mxu1 %v915_v36  ;;  %v2696_v18 = vunpack.i.l.bf16 %v3690_v30  ;;  %v838_v33 = vsel %vm53_vm3, %v2662_v16, %v2722_v13  ;;  %v837_v6 = vsel %vm53_vm3, %v2661_v1, %v2721_v2  ;;  %v918_v29 = vpack.c.bf16 %v836_v14, %v835_v17 }
 0x218   :  { %1040 = vmatprep.subr.bf16.mxu1 %v932_v22  ;;  %999 = vmatprep.subr.bf16.mxu0 %v924_v11  ;;  %v2702_v30 = vunpack.i.h.bf16 %v3701_v34  ;;  %v926_v48 = vpack.c.bf16 %v868_v25, %v867_v46  ;;  %v925_v13 = vpack.c.bf16 %v870_v63, %v869_v44  ;;  %v832_v16 = vsel %vm53_vm3, %v2697_v54, %v2732_v5 }
 0x219   :  { %v3789_v39 = vpop.permute.xlu0 %2739  ;;  %v2745_v38 = vpop.permute.xlu1 %2744  ;;  %1000 = vmatpush1.bf16.msra.mxu0 %v923_v26  ;;  %v831_v1 = vsel %vm53_vm3, %v2696_v18, %v2731_v24  ;;  %v2682_v2 = vunpack.i.h.bf16 %v3692_v53  ;;  %v917_v37 = vpack.c.bf16 %v838_v33, %v837_v6  ;;  %v833_v24 = vsel %vm53_vm3, %v2676_v28, %v2696_v18 }
 0x21a   :  { %v2747_v43 = vunpack.i.h.bf16 %v2745_v38  ;;  %v2746_v20 = vunpack.i.l.bf16 %v2745_v38  ;;  %2486 = vmatmul.mubr.msk.bf16.vlgmr.msra.gmra.mxu1 %vm940_vm10, %v3767_v0  ;;  %1001 = vmatprep.subr.bf16.mxu0 %v918_v29  ;;  %v834_v5 = vsel %vm53_vm3, %v2677_v32, %v2697_v54  ;;  %v1157_v26 = vsel %vm322_vm5, %v2681_v31, %v2701_v50 }
 0x21b   :  { %1041 = vmatpush1.bf16.msra.mxu1 %v931_v42  ;;  %1062 = vmatprep.mubr.bf16.mxu1 %v3136_v9  ;;  %v920_v17 = vpack.c.bf16 %v832_v16, %v831_v1  ;;  %v1158_v32 = vsel %vm322_vm5, %v2682_v2, %v2702_v30  ;;  %v1160_v14 = vsel %vm322_vm5, %v2647_v49, %v2682_v2  ;;  %v2727_v18 = vunpack.i.h.bf16 %v3752_v19 }
 0x21c   :  { %1042 = vmatprep.subr.bf16.mxu1 %v926_v48  ;;  %v1161_v47 = vsel %vm322_vm5, %v2746_v20, %v2646_v56  ;;  %v1162_v36 = vsel %vm322_vm5, %v2747_v43, %v2647_v49  ;;  %v919_v46 = vpack.c.bf16 %v834_v5, %v833_v24  ;;  %v1159_v25 = vsel %vm322_vm5, %v2646_v56, %v2681_v31 }
 0x21d   :  { %v3812_v62 = vpop.permute.xlu0 %2749  ;;  %v3814_v53 = vpop.permute.xlu1 %2754  ;;  %v1180_v10 = vpack.c.bf16 %v1162_v36, %v1161_v47  ;;  %1002 = vmatpush1.bf16.msra.mxu0 %v917_v37  ;;  %v1182_v54 = vpack.c.bf16 %v1158_v32, %v1157_v26  ;;  %v2726_v33 = vunpack.i.l.bf16 %v3752_v19  ;;  %v2737_v6 = vunpack.i.h.bf16 %v3754_v41 }
 0x21e   :  { %v2752_v22 = vunpack.i.h.bf16 %v3812_v62  ;;  %v2751_v28 = vunpack.i.l.bf16 %v3812_v62  ;;  %v2736_v35 = vunpack.i.l.bf16 %v3754_v41  ;;  %v2742_v56 = vunpack.i.h.bf16 %v3789_v39 }
 0x21f   :  { %1043 = vmatpush1.bf16.msra.mxu1 %v925_v13  ;;  %1206 = vmatprep.subr.bf16.mxu0 %v1180_v10  ;;  %v2741_v38 = vunpack.i.l.bf16 %v3789_v39  ;;  %v4805_v29 = vpack.c.bf16 %v3538_v15, %v3544_v23  ;;  %v1124_v15 = vsel %vm303_vm6, %v2727_v18, %v2737_v6  ;;  %v2757_v23 = vunpack.i.h.bf16 %v3814_v53 }
 0x220   :  { %v1163_v42 = vsel %vm322_vm5, %v2751_v28, %v2746_v20  ;;  %v1164_v11 = vsel %vm322_vm5, %v2752_v22, %v2747_v43  ;;  %1044 = vmatprep.subr.bf16.mxu1 %v920_v17  ;;  %2487 = vmatmul.mubr.msk.bf16.vlgmr.msra.gmra.mxu0 %vm940_vm10, %v3767_v0  ;;  %v1181_v43 = vpack.c.bf16 %v1160_v14, %v1159_v25  ;;  %v2756_v31 = vunpack.i.l.bf16 %v3814_v53 }
 0x221   :  { %v1179_v44 = vpack.c.bf16 %v1164_v11, %v1163_v42  ;;  %v3845_v49 = vpop.permute.xlu0 %2759  ;;  %v3847_v63 = vpop.permute.xlu1 %2764  ;;  %1228 = vmatprep.mubr.bf16.mxu0 %v3136_v9  ;;  %v1123_v39 = vsel %vm303_vm6, %v2726_v33, %v2736_v35  ;;  %v1125_v2 = vsel %vm303_vm6, %v2741_v38, %v2726_v33  ;;  %v1126_v37 = vsel %vm303_vm6, %v2742_v56, %v2727_v18 }
 0x222   :  { %v2762_v19 = vunpack.i.h.bf16 %v3845_v49  ;;  %v2761_v20 = vunpack.i.l.bf16 %v3845_v49  ;;  %v2767_v1 = vunpack.i.h.bf16 %v3847_v63  ;;  %v2766_v16 = vunpack.i.l.bf16 %v3847_v63 }
 0x223   :  { %1045 = vmatpush1.bf16.msra.mxu1 %v919_v46  ;;  %1207 = vmatpush1.bf16.msra.mxu0 %v1179_v44  ;;  %v4807_v24 = vpack.c.bf16 %v3574_v59, %v3584_v8  ;;  %v1170_v17 = vpack.c.bf16 %v1124_v15, %v1123_v39  ;;  %v1169_v32 = vpack.c.bf16 %v1126_v37, %v1125_v2  ;;  %v3932_v15 = vld [vmem:[%s4797_s4 + $0x8] sm:$0xff]  }
 0x224   :  { %1208 = vmatprep.subr.bf16.mxu0 %v4805_v29  ;;  %1249 = vmatprep.subr.bf16.mxu1 %v1182_v54  ;;  %v1439_v10 = vsel %vm561_vm7, %v2756_v31, %v2761_v20  ;;  %v1440_v26 = vsel %vm561_vm7, %v2757_v23, %v2762_v19  ;;  %v1441_v14 = vsel %vm561_vm7, %v2766_v16, %v2756_v31 }
 0x225   :  { %v2770_v48 = vpop.permute.xlu0 %2769  ;;  %v3861_v13 = vpop.permute.xlu1 %2774  ;;  %v1442_v42 = vsel %vm561_vm7, %v2767_v1, %v2757_v23  ;;  %v4808_v11 = vpack.c.bf16 %v3557_v27, %v3554_v51  ;;  %v1458_v44 = vpack.c.bf16 %v1440_v26, %v1439_v10 }
 0x226   :  { %2488 = vmatmul.mubr.msk.bf16.vlgmr.msra.gmra.mxu1 %vm940_vm10, %v3767_v0  ;;  %v4806_v0 = vpack.c.bf16 %v3516_v58, %v3513_v55  ;;  %v2771_v47 = vunpack.i.l.bf16 %v2770_v48  ;;  %v2776_v36 = vunpack.i.l.bf16 %v3861_v13  ;;  %v2772_v5 = vunpack.i.h.bf16 %v2770_v48 }
 0x227   :  { %1250 = vmatpush1.bf16.msra.mxu1 %v1181_v43  ;;  %1271 = vmatprep.mubr.bf16.mxu1 %v3136_v9  ;;  %v2777_v55 = vunpack.i.h.bf16 %v3861_v13  ;;  %v1457_v23 = vpack.c.bf16 %v1442_v42, %v1441_v14 }
 0x228   :  { %1209 = vmatpush1.bf16.msra.mxu0 %v4806_v0  ;;  %1251 = vmatprep.subr.bf16.mxu1 %v4807_v24  ;;  %v1403_v54 = vsel %vm542_vm9, %v2771_v47, %v2776_v36 }
 0x229   :  { %v3890_v58 = vpop.permute.xlu0 %2779  ;;  %v2785_v53 = vpop.permute.xlu1 %2784 }
 0x22a   :  { %v2787_v59 = vunpack.i.h.bf16 %v2785_v53  ;;  %v2786_v8 = vunpack.i.l.bf16 %v2785_v53  ;;  %v2782_v18 = vunpack.i.h.bf16 %v3890_v58  ;;  %v2781_v33 = vunpack.i.l.bf16 %v3890_v58 }
 0x22b   :  { %1252 = vmatpush1.bf16.msra.mxu1 %v4808_v11 }
 0x22c   :  { %1253 = vmatprep.subr.bf16.mxu1 %v1170_v17  ;;  %v1127_v46 = vsel %vm303_vm6, %v2786_v8, %v2741_v38  ;;  %v1128_v25 = vsel %vm303_vm6, %v2787_v59, %v2742_v56  ;;  %v1404_v38 = vsel %vm542_vm9, %v2772_v5, %v2777_v55  ;;  %v1405_v0 = vsel %vm542_vm9, %v2781_v33, %v2771_v47 }
 0x22d   :  { %v3921_v29 = vpop.permute.xlu0 %2794  ;;  %v2790_v51 = vpop.permute.xlu1 %2789  ;;  %v1168_v27 = vpack.c.bf16 %v1128_v25, %v1127_v46  ;;  %v1452_v31 = vpack.c.bf16 %v1404_v38, %v1403_v54  ;;  %v1406_v2 = vsel %vm542_vm9, %v2782_v18, %v2772_v5 }
 0x22e   :  { %v2797_v56 = vunpack.i.h.bf16 %v3921_v29  ;;  %v2796_v43 = vunpack.i.l.bf16 %v3921_v29  ;;  %v2792_v48 = vunpack.i.h.bf16 %v2790_v51  ;;  %v2791_v39 = vunpack.i.l.bf16 %v2790_v51 }
 0x22f   :  { %1210 = vmatprep.subr.bf16.mxu0 %v1168_v27  ;;  %1254 = vmatpush1.bf16.msra.mxu1 %v1169_v32  ;;  %v1451_v46 = vpack.c.bf16 %v1406_v2, %v1405_v0 }
 0x230   :  { %1484 = vmatprep.subr.bf16.mxu1 %v1458_v44  ;;  %v1367_v53 = vsel %vm523_vm8, %v2791_v39, %v2796_v43  ;;  %v1368_v10 = vsel %vm523_vm8, %v2792_v48, %v2797_v56 }
 0x231   :  { %v3942_v37 = vpop.permute.xlu0 %2804  ;;  %v3944_v24 = vpop.permute.xlu1 %2799  ;;  %v1446_v54 = vpack.c.bf16 %v1368_v10, %v1367_v53 }
 0x232   :  { %v2807_v47 = vunpack.i.h.bf16 %v3942_v37  ;;  %v2806_v26 = vunpack.i.l.bf16 %v3942_v37  ;;  %v2802_v5 = vunpack.i.h.bf16 %v3944_v24  ;;  %v2801_v17 = vunpack.i.l.bf16 %v3944_v24  ;;  %2493 = vmatmul.mubr.msk.bf16.vlgmr.msra.gmra.mxu1 %vm940_vm10, %v3932_v15 }
 0x233   :  { %1485 = vmatpush1.bf16.msra.mxu1 %v1457_v23  ;;  %1506 = vmatprep.mubr.bf16.mxu1 %v3136_v9 }
 0x234   :  { %v1129_v32 = vsel %vm303_vm6, %v2806_v26, %v2786_v8  ;;  %v1130_v14 = vsel %vm303_vm6, %v2807_v47, %v2787_v59  ;;  %v1369_v42 = vsel %vm523_vm8, %v2801_v17, %v2791_v39  ;;  %v1370_v11 = vsel %vm523_vm8, %v2802_v5, %v2792_v48  ;;  %1486 = vmatprep.subr.bf16.mxu1 %v1452_v31 }
 0x235   :  { %v1167_v25 = vpack.c.bf16 %v1130_v14, %v1129_v32  ;;  %v2810_v44 = vpop.permute.xlu0 %2809  ;;  %v2825_v8 = vpop.permute.xlu1 %2824  ;;  %v1445_v23 = vpack.c.bf16 %v1370_v11, %v1369_v42  ;;  %v4010_v14 = vld [vmem:[%s4797_s4 + $0x10] sm:$0xff]  }
 0x236   :  { %v2812_v51 = vunpack.i.h.bf16 %v2810_v44  ;;  %v2811_v27 = vunpack.i.l.bf16 %v2810_v44  ;;  %v2827_v38 = vunpack.i.h.bf16 %v2825_v8  ;;  %v2826_v59 = vunpack.i.l.bf16 %v2825_v8 }
 0x237   :  { %1211 = vmatpush1.bf16.msra.mxu0 %v1167_v25  ;;  %1487 = vmatpush1.bf16.msra.mxu1 %v1451_v46  ;;  %v4809_v8 = vpack.c.bf16 %v3587_v40, %v3590_v7 }
 0x238   :  { %v1156_v39 = vsel %vm322_vm5, %v2702_v30, %v2812_v51  ;;  %v1155_v48 = vsel %vm322_vm5, %v2701_v50, %v2811_v27  ;;  %1488 = vmatprep.subr.bf16.mxu1 %v1446_v54  ;;  %v1165_v31 = vsel %vm322_vm5, %v2811_v27, %v2751_v28  ;;  %v1166_v0 = vsel %vm322_vm5, %v2812_v51, %v2752_v22 }
 0x239   :  { %v1183_v2 = vpack.c.bf16 %v1156_v39, %v1155_v48  ;;  %v3993_v53 = vpop.permute.xlu0 %2814  ;;  %v2830_v30 = vpop.permute.xlu1 %2829  ;;  %v1184_v10 = vpack.c.bf16 %v1166_v0, %v1165_v31  ;;  %v1443_v34 = vsel %vm561_vm7, %v2826_v59, %v2766_v16  ;;  %v1444_v50 = vsel %vm561_vm7, %v2827_v38, %v2767_v1 }
 0x23a   :  { %v2817_v62 = vunpack.i.h.bf16 %v3993_v53  ;;  %v2816_v28 = vunpack.i.l.bf16 %v3993_v53  ;;  %v2832_v22 = vunpack.i.h.bf16 %v2830_v30  ;;  %v2831_v32 = vunpack.i.l.bf16 %v2830_v30  ;;  %2492 = vmatmul.mubr.msk.bf16.vlgmr.msra.gmra.mxu0 %vm940_vm10, %v3932_v15 }
 0x23b   :  { %1292 = vmatprep.subr.bf16.mxu0 %v1184_v10  ;;  %1489 = vmatpush1.bf16.msra.mxu1 %v1445_v23  ;;  %v1462_v63 = vpack.c.bf16 %v1444_v50, %v1443_v34 }
 0x23c   :  { %v1433_v1 = vsel %vm561_vm7, %v2816_v28, %v2826_v59  ;;  %v1434_v16 = vsel %vm561_vm7, %v2817_v62, %v2827_v38  ;;  %1293 = vmatpush1.bf16.msra.mxu0 %v1183_v2  ;;  %v1407_v42 = vsel %vm542_vm9, %v2831_v32, %v2781_v33  ;;  %v1408_v11 = vsel %vm542_vm9, %v2832_v22, %v2782_v18 }
 0x23d   :  { %v1461_v46 = vpack.c.bf16 %v1434_v16, %v1433_v1  ;;  %1570 = vmatprep.subr.bf16.mxu1 %v1462_v63  ;;  %v2820_v25 = vpop.permute.xlu0 %2819  ;;  %v2835_v44 = vpop.permute.xlu1 %2834  ;;  %1294 = vmatprep.subr.bf16.mxu0 %v4809_v8  ;;  %v1456_v54 = vpack.c.bf16 %v1408_v11, %v1407_v42  ;;  %v4810_v33 = vpack.c.bf16 %v3571_v61, %v3581_v3 }
 0x23e   :  { %v2822_v51 = vunpack.i.h.bf16 %v2820_v25  ;;  %v2821_v27 = vunpack.i.l.bf16 %v2820_v25  ;;  %v2837_v38 = vunpack.i.h.bf16 %v2835_v44  ;;  %v2836_v59 = vunpack.i.l.bf16 %v2835_v44  ;;  %2498 = vmatmul.mubr.msk.bf16.vlgmr.msra.gmra.mxu1 %vm940_vm10, %v4010_v14  ;;  %1314 = vmatprep.mubr.bf16.mxu0 %v3136_v9 }
 0x23f   :  { %1571 = vmatpush1.bf16.msra.mxu1 %v1461_v46  ;;  %1592 = vmatprep.mubr.bf16.mxu1 %v3136_v9 }
 0x240   :  { %v1397_v58 = vsel %vm542_vm9, %v2821_v27, %v2831_v32  ;;  %v1398_v40 = vsel %vm542_vm9, %v2822_v51, %v2832_v22  ;;  %v1121_v7 = vsel %vm303_vm6, %v2736_v35, %v2836_v59  ;;  %v1122_v18 = vsel %vm303_vm6, %v2737_v6, %v2837_v38  ;;  %1295 = vmatpush1.bf16.msra.mxu0 %v4810_v33 }
 0x241   :  { %v1455_v23 = vpack.c.bf16 %v1398_v40, %v1397_v58  ;;  %v1171_v39 = vpack.c.bf16 %v1122_v18, %v1121_v7  ;;  %1572 = vmatprep.subr.bf16.mxu1 %v1456_v54  ;;  %v2845_v48 = vpop.permute.xlu0 %2844  ;;  %v2840_v31 = vpop.permute.xlu1 %2839  ;;  %v1119_v0 = vsel %vm303_vm6, %v2836_v59, %v2806_v26  ;;  %v1120_v41 = vsel %vm303_vm6, %v2837_v38, %v2807_v47 }
 0x242   :  { %v2847_v6 = vunpack.i.h.bf16 %v2845_v48  ;;  %v2846_v35 = vunpack.i.l.bf16 %v2845_v48  ;;  %v2842_v2 = vunpack.i.h.bf16 %v2840_v31  ;;  %v2841_v61 = vunpack.i.l.bf16 %v2840_v31 }
 0x243   :  { %v1172_v3 = vpack.c.bf16 %v1120_v41, %v1119_v0  ;;  %1573 = vmatpush1.bf16.msra.mxu1 %v1455_v23 }
 0x244   :  { %v1362_v30 = vsel %vm523_vm8, %v2842_v2, %v2847_v6  ;;  %v1361_v10 = vsel %vm523_vm8, %v2841_v61, %v2846_v35  ;;  %v1371_v37 = vsel %vm523_vm8, %v2846_v35, %v2801_v17  ;;  %v1372_v47 = vsel %vm523_vm8, %v2847_v6, %v2802_v5 }
 0x245   :  { %v1449_v26 = vpack.c.bf16 %v1362_v30, %v1361_v10  ;;  %1296 = vmatprep.subr.bf16.mxu0 %v1172_v3  ;;  %v2850_v34 = vpop.permute.xlu0 %2849  ;;  %v2855_v50 = vpop.permute.xlu1 %2854  ;;  %v1450_v22 = vpack.c.bf16 %v1372_v47, %v1371_v37 }
 0x246   :  { %1297 = vmatpush1.bf16.msra.mxu0 %v1171_v39  ;;  %v2852_v32 = vunpack.i.h.bf16 %v2850_v34  ;;  %v2851_v63 = vunpack.i.l.bf16 %v2850_v34  ;;  %v2856_v1 = vunpack.i.l.bf16 %v2855_v50  ;;  %v2857_v16 = vunpack.i.h.bf16 %v2855_v50 }
 0x247   :  { %1574 = vmatprep.subr.bf16.mxu1 %v1450_v22 }
 0x248   :  { %v1437_v17 = vsel %vm561_vm7, %v2761_v20, %v2851_v63  ;;  %v1438_v24 = vsel %vm561_vm7, %v2762_v19, %v2852_v32  ;;  %1575 = vmatpush1.bf16.msra.mxu1 %v1449_v26  ;;  %v1435_v11 = vsel %vm561_vm7, %v2851_v63, %v2816_v28  ;;  %v1436_v20 = vsel %vm561_vm7, %v2852_v32, %v2817_v62 }
 0x249   :  { %v1459_v5 = vpack.c.bf16 %v1438_v24, %v1437_v17  ;;  %2494 = vmatmul.mubr.msk.bf16.vlgmr.msra.gmra.mxu0 %vm940_vm10, %v3932_v15  ;;  %v2860_v42 = vpop.permute.xlu0 %2859  ;;  %v1460_v25 = vpack.c.bf16 %v1436_v20, %v1435_v11  ;;  %v1399_v19 = vsel %vm542_vm9, %v2856_v1, %v2821_v27  ;;  %v1400_v15 = vsel %vm542_vm9, %v2857_v16, %v2822_v51 }
 0x24a   :  { %v2862_v49 = vunpack.i.h.bf16 %v2860_v42  ;;  %v2861_v46 = vunpack.i.l.bf16 %v2860_v42  ;;  %1549 = vmatprep.mubr.bf16.mxu0 %v3136_v9  ;;  %v1401_v53 = vsel %vm542_vm9, %v2776_v36, %v2856_v1  ;;  %v1402_v62 = vsel %vm542_vm9, %v2777_v55, %v2857_v16 }
 0x24b   :  { %2500 = vmatmul.mubr.msk.bf16.vlgmr.msra.gmra.mxu1 %vm940_vm10, %v4010_v14  ;;  %1527 = vmatprep.subr.bf16.mxu0 %v1460_v25  ;;  %v1454_v28 = vpack.c.bf16 %v1400_v15, %v1399_v19  ;;  %v1453_v54 = vpack.c.bf16 %v1402_v62, %v1401_v53 }
 0x24c   :  { %1528 = vmatpush1.bf16.msra.mxu0 %v1459_v5  ;;  %v1363_v44 = vsel %vm523_vm8, %v2861_v46, %v2841_v61  ;;  %v1364_v8 = vsel %vm523_vm8, %v2862_v49, %v2842_v2  ;;  %1843 = vmatprep.mubr.bf16.mxu1 %v3136_v9  ;;  %v1365_v13 = vsel %vm523_vm8, %v2796_v43, %v2861_v46 }
 0x24d   :  { %1529 = vmatprep.subr.bf16.mxu0 %v1454_v28  ;;  %v1366_v36 = vsel %vm523_vm8, %v2797_v56, %v2862_v49  ;;  %v1448_v55 = vpack.c.bf16 %v1364_v8, %v1363_v44 }
 0x24e   :  { %v1447_v51 = vpack.c.bf16 %v1366_v36, %v1365_v13 }
 0x250   :  { %1530 = vmatpush1.bf16.msra.mxu0 %v1453_v54 }
 0x251   :  { %1531 = vmatprep.subr.bf16.mxu0 %v1448_v55 }
 0x252   :  { %v1076_v61 = vpop.permute.xlu1 %1075 }
 0x254   :  { %1532 = vmatpush1.bf16.msra.mxu0 %v1447_v51 }
 0x256   :  { %v4135_v6 = vpop.permute.xlu0 %1080 }
 0x257   :  { %2499 = vmatmul.mubr.msk.bf16.vlgmr.msra.gmra.mxu0 %vm940_vm10, %v4010_v14 }
 0x258   :  { %1802 = vmatprep.mubr.bf16.mxu0 %v3136_v9 }
 0x2da   :  { %v978_v27 = vpop.f32.mrf.mxu1 }
 0x2db   :  { %v1083_v47 = vadd.f32 %v1076_v61, %v978_v27 }
 0x2dc   :  { %v980_v38 = vpop.f32.mrf.mxu1 }
 0x2dd   :  { %v1084_v30 = vadd.f32 %v1076_v61, %v980_v38 }
 0x2de   :  { %v982_v59 = vpop.f32.mrf.mxu1 }
 0x2df   :  { %v1089_v3 = vadd.f32 %v4135_v6, %v982_v59 }
 0x2e0   :  { %v984_v58 = vpop.f32.mrf.mxu1  ;;  %v4119_v29 = vpop.f32.mrf.mxu0 }
 0x2e1   :  { %v1090_v26 = vadd.f32 %v4135_v6, %v984_v58 }
 0x2e2   :  { %v4121_v56 = vpop.f32.mrf.mxu0 }
 0x2e4   :  { %v4125_v23 = vpop.f32.mrf.mxu0 }
 0x2e6   :  { %v1064_v43 = vpop.f32.mrf.mxu1  ;;  %v4129_v14 = vpop.f32.mrf.mxu0 }
 0x2e7   :  { %v1087_v62 = vadd.f32 %v1076_v61, %v1064_v43 }
 0x2e8   :  { %v1066_v40 = vpop.f32.mrf.mxu1 }
 0x2e9   :  { %v1088_v28 = vadd.f32 %v1076_v61, %v1066_v40 }
 0x2ea   :  { %v1068_v7 = vpop.f32.mrf.mxu1 }
 0x2eb   :  { %v1093_v44 = vadd.f32 %v4135_v6, %v1068_v7 }
 0x2ec   :  { %v1070_v18 = vpop.f32.mrf.mxu1 }
 0x2ed   :  { %v1094_v54 = vadd.f32 %v4135_v6, %v1070_v18 }
 0x2f2   :  { %v4123_v33 = vpop.f32.mrf.mxu1 }
 0x2f4   :  { %v4127_v39 = vpop.f32.mrf.mxu1 }
 0x2f6   :  { %v4131_v48 = vpop.f32.mrf.mxu1 }
 0x2f8   :  { %v4133_v0 = vpop.f32.mrf.mxu1 }
 0x2fa   :  { %v1230_v31 = vpop.f32.mrf.mxu0 }
 0x2fb   :  { %v1325_v32 = vadd.f32 %v1230_v31, %v1083_v47  ;;  %v1085_v47 = vadd.f32 %v1076_v61, %v4119_v29  ;;  %v1091_v29 = vadd.f32 %v4135_v6, %v4125_v23 }
 0x2fc   :  { %v1232_v41 = vpop.f32.mrf.mxu0 }
 0x2fd   :  { %v1326_v50 = vadd.f32 %v1232_v41, %v1084_v30 }
 0x2fe   :  { %v1234_v35 = vpop.f32.mrf.mxu0  ;;  %v1508_v2 = vpop.f32.mrf.mxu1 }
 0x2ff   :  { %v1331_v34 = vadd.f32 %v1234_v35, %v1089_v3  ;;  %v1603_v24 = vadd.f32 %v1508_v2, %v1325_v32 }
 0x300   :  { %v1236_v10 = vpop.f32.mrf.mxu0  ;;  %v1510_v37 = vpop.f32.mrf.mxu1 }
 0x301   :  { %v1332_v63 = vadd.f32 %v1236_v10, %v1090_v26  ;;  %v1604_v16 = vadd.f32 %v1510_v37, %v1326_v50  ;;  %v1615_v49 = vmax.f32 %v1603_v24, 0.0  ;;  %v1327_v50 = vadd.f32 %v4123_v33, %v1085_v47 }
 0x302   :  { %v1512_v22 = vpop.f32.mrf.mxu1 }
 0x303   :  { %v1609_v1 = vadd.f32 %v1512_v22, %v1331_v34  ;;  %v1616_v20 = vmax.f32 %v1604_v16, 0.0  ;;  %v4151_v13 = vmul.f32 %v1615_v49, %v3509_v45  ;;  %v1086_v22 = vadd.f32 %v1076_v61, %v4121_v56 }
 0x304   :  { %v1514_v17 = vpop.f32.mrf.mxu1  ;;  %v1092_v61 = vadd.f32 %v4135_v6, %v4129_v14 }
 0x305   :  { %v1610_v5 = vadd.f32 %v1514_v17, %v1332_v63  ;;  %v1621_v42 = vmax.f32 %v1609_v1, 0.0  ;;  %v4147_v8 = vmul.f32 %v1616_v20, %v3520_v60  ;;  %v1328_v17 = vadd.f32 %v4127_v39, %v1086_v22 }
 0x306   :  { %v1334_v39 = vadd.f32 %v4133_v0, %v1092_v61 }
 0x307   :  { %v1622_v11 = vmax.f32 %v1610_v5, 0.0  ;;  %v4143_v19 = vmul.f32 %v1621_v42, %v3509_v45  ;;  %v1333_v42 = vadd.f32 %v4131_v48, %v1091_v29 }
 0x309   :  { %v1316_v46 = vpop.f32.mrf.mxu0  ;;  %v4140_v25 = vmul.f32 %v1622_v11, %v3520_v60  ;;  %v1982_v40 = vpack.c.bf16 %v4143_v19, %v4151_v13 }
 0x30a   :  { %v1329_v51 = vadd.f32 %v1316_v46, %v1087_v62 }
 0x30b   :  { %v1318_v15 = vpop.f32.mrf.mxu0  ;;  %v1594_v53 = vpop.f32.mrf.mxu1  ;;  %v1983_v59 = vpack.c.bf16 %v4140_v25, %v4147_v8 }
 0x30c   :  { %v1330_v27 = vadd.f32 %v1318_v15, %v1088_v28  ;;  %v1607_v7 = vadd.f32 %v1594_v53, %v1329_v51  ;;  %v2908_v51 = vpack.i.bf16 %v4143_v19, %v4151_v13 }
 0x30d   :  { %v1320_v36 = vpop.f32.mrf.mxu0  ;;  %v1596_v55 = vpop.f32.mrf.mxu1 }
 0x30e   :  { %v1335_v38 = vadd.f32 %v1320_v36, %v1093_v44  ;;  %v1608_v41 = vadd.f32 %v1596_v55, %v1330_v27  ;;  %v1619_v30 = vmax.f32 %v1607_v7, 0.0  ;;  %v2918_v27 = vpack.i.bf16 %v4140_v25, %v4147_v8 }
 0x30f   :  { %v1322_v58 = vpop.f32.mrf.mxu0  ;;  %v1598_v43 = vpop.f32.mrf.mxu1 }
 0x310   :  { %v1336_v31 = vadd.f32 %v1322_v58, %v1094_v54  ;;  %v1613_v18 = vadd.f32 %v1598_v43, %v1335_v38  ;;  %v1620_v10 = vmax.f32 %v1608_v41, 0.0  ;;  %v4167_v32 = vmul.f32 %v1619_v30, %v3560_v4  ;;  %v1639_v58 = vld [vmem:[%s4799_s7] sm:$0xff] }
 0x311   :  { %v1600_v35 = vpop.f32.mrf.mxu1 }
 0x312   :  { %v1625_v2 = vmax.f32 %v1613_v18, 0.0  ;;  %v1614_v3 = vadd.f32 %v1600_v35, %v1336_v31  ;;  %v4170_v63 = vmul.f32 %v1620_v10, %v3568_v57 }
 0x314   :  { %v1626_v37 = vmax.f32 %v1614_v3, 0.0  ;;  %v4159_v26 = vmul.f32 %v1625_v2, %v3560_v4 }
 0x316   :  { %v4162_v34 = vmul.f32 %v1626_v37, %v3568_v57  ;;  %v4177_v5 = vpack.i.bf16 %v4159_v26, %v4167_v32 }
 0x317   :  { %v1551_v1 = vpop.f32.mrf.mxu0 }
 0x318   :  { %v1605_v16 = vadd.f32 %v1551_v1, %v1327_v50  ;;  %v2958_v38 = vpack.i.bf16 %v4162_v34, %v4170_v63 }
 0x319   :  { %v1553_v24 = vpop.f32.mrf.mxu0 }
 0x31a   :  { %v1606_v23 = vadd.f32 %v1553_v24, %v1328_v17  ;;  %v1617_v20 = vmax.f32 %v1605_v16, 0.0 }
 0x31b   :  { %v1555_v11 = vpop.f32.mrf.mxu0 }
 0x31c   :  { %v1611_v49 = vadd.f32 %v1555_v11, %v1333_v42  ;;  %v1618_v62 = vmax.f32 %v1606_v23, 0.0  ;;  %v4188_v28 = vmul.f32 %v1617_v20, %v3528_v12 }
 0x31d   :  { %v1557_v46 = vpop.f32.mrf.mxu0 }
 0x31e   :  { %v1623_v15 = vmax.f32 %v1611_v49, 0.0  ;;  %v1612_v53 = vadd.f32 %v1557_v46, %v1334_v39  ;;  %v4199_v0 = vmul.f32 %v1618_v62, %v3563_v52 }
 0x320   :  { %v4191_v44 = vmul.f32 %v1623_v15, %v3528_v12  ;;  %v1624_v54 = vmax.f32 %v1612_v53, 0.0 }
 0x322   :  { %v4194_v14 = vmul.f32 %v1624_v54, %v3563_v52  ;;  %v2868_v48 = vpack.i.bf16 %v4191_v44, %v4188_v28 }
 0x324   :  { %2869 = vrot.lane.b32.xlu1 %v2868_v48, %s3135_s17  ;;  %2864 = vrot.lane.b32.xlu0 %v2868_v48, %s3134_s14  ;;  %v2883_v6 = vpack.i.bf16 %v4194_v14, %v4199_v0 }
 0x328   :  { %2874 = vrot.lane.b32.xlu0 %v2868_v48, %s3133_s13  ;;  %2884 = vrot.lane.b32.xlu1 %v2883_v6, %s3134_s14 }
 0x32c   :  { %2879 = vrot.lane.b32.xlu0 %v2868_v48, %s3137_s0  ;;  %2894 = vrot.lane.b32.xlu1 %v2883_v6, %s3133_s13 }
 0x330   :  { %2889 = vrot.lane.b32.xlu0 %v2883_v6, %s3135_s17  ;;  %2899 = vrot.lane.b32.xlu1 %v2883_v6, %s3137_s0 }
 0x334   :  { %2909 = vrot.lane.b32.xlu0 %v2908_v51, %s3135_s17  ;;  %2904 = vrot.lane.b32.xlu1 %v2908_v51, %s3134_s14 }
 0x338   :  { %2919 = vrot.lane.b32.xlu0 %v2918_v27, %s3134_s14  ;;  %2914 = vrot.lane.b32.xlu1 %v2908_v51, %s3133_s13 }
 0x33c   :  { %2929 = vrot.lane.b32.xlu0 %v2918_v27, %s3133_s13  ;;  %2924 = vrot.lane.b32.xlu1 %v2918_v27, %s3135_s17 }
 0x340   :  { %2939 = vrot.lane.b32.xlu0 %v4177_v5, %s3134_s14  ;;  %2934 = vrot.lane.b32.xlu1 %v2918_v27, %s3137_s0 }
 0x344   :  { %2949 = vrot.lane.b32.xlu0 %v4177_v5, %s3133_s13  ;;  %2944 = vrot.lane.b32.xlu1 %v4177_v5, %s3135_s17 }
 0x348   :  { %2954 = vrot.lane.b32.xlu0 %v4177_v5, %s3137_s0  ;;  %2959 = vrot.lane.b32.xlu1 %v2958_v38, %s3134_s14 }
 0x34c   :  { %2969 = vrot.lane.b32.xlu0 %v2958_v38, %s3135_s17  ;;  %2964 = vrot.lane.b32.xlu1 %v2908_v51, %s3137_s0 }
 0x350   :  { %2974 = vrot.lane.b32.xlu0 %v2908_v51, %s3138_s20  ;;  %2979 = vrot.lane.b32.xlu1 %v2958_v38, %s3133_s13 }
 0x354   :  { %2989 = vrot.lane.b32.xlu0 %v2868_v48, %s3138_s20  ;;  %2984 = vrot.lane.b32.xlu1 %v2918_v27, %s3138_s20 }
 0x358   :  { %2999 = vrot.lane.b32.xlu0 %v2918_v27, %s3139_s21  ;;  %2994 = vrot.lane.b32.xlu1 %v2883_v6, %s3138_s20 }
 0x35c   :  { %3009 = vrot.lane.b32.xlu0 %v2908_v51, %s3139_s21  ;;  %3004 = vrot.lane.b32.xlu1 %v2868_v48, %s3139_s21 }
 0x360   :  { %3019 = vrot.lane.b32.xlu0 %v2868_v48, %s3141_s23  ;;  %3014 = vrot.lane.b32.xlu1 %v2918_v27, %s3141_s23 }
 0x364   :  { %3029 = vrot.lane.b32.xlu0 %v4177_v5, %s3138_s20  ;;  %3024 = vrot.lane.b32.xlu1 %v2908_v51, %s3141_s23 }
 0x368   :  { %3039 = vrot.lane.b32.xlu0 %v2958_v38, %s3138_s20  ;;  %3034 = vrot.lane.b32.xlu1 %v2918_v27, %s3140_s22 }
 0x36c   :  { %3044 = vrot.lane.b32.xlu0 %v2868_v48, %s3140_s22  ;;  %3049 = vrot.lane.b32.xlu1 %v2958_v38, %s3137_s0 }
 0x370   :  { %3059 = vrot.lane.b32.xlu0 %v2883_v6, %s3139_s21  ;;  %3054 = vrot.lane.b32.xlu1 %v2908_v51, %s3140_s22 }
 0x374   :  { %3074 = vrot.lane.b32.xlu0 %v4177_v5, %s3141_s23  ;;  %3064 = vrot.lane.b32.xlu1 %v4177_v5, %s3139_s21 }
 0x378   :  { %3079 = vrot.lane.b32.xlu0 %v2958_v38, %s3139_s21  ;;  %3069 = vrot.lane.b32.xlu1 %v2883_v6, %s3141_s23 }
 0x37c   :  { %3084 = vrot.lane.b32.xlu0 %v2883_v6, %s3140_s22  ;;  %3089 = vrot.lane.b32.xlu1 %v2958_v38, %s3141_s23 }
 0x380   :  { %3099 = vrot.lane.b32.xlu0 %v2958_v38, %s3140_s22  ;;  %3094 = vrot.lane.b32.xlu1 %v4177_v5, %s3140_s22 }
 0x384   :  { %1895 = vperm.xlu1 %2622, %v1639_v58  }
 0x396   :  { %v2870_v43 = vpop.permute.xlu1 %2869  ;;  %v2865_v7 = vpop.permute.xlu0 %2864 }
 0x397   :  { %v2867_v18 = vunpack.i.h.bf16 %v2865_v7  ;;  %v2866_v35 = vunpack.i.l.bf16 %v2865_v7  ;;  %v2872_v5 = vunpack.i.h.bf16 %v2870_v43  ;;  %v2871_v61 = vunpack.i.l.bf16 %v2870_v43 }
 0x39a   :  { %v2875_v31 = vpop.permute.xlu0 %2874  ;;  %v4272_v41 = vpop.permute.xlu1 %2884 }
 0x39b   :  { %v2887_v2 = vunpack.i.h.bf16 %v4272_v41  ;;  %v2886_v3 = vunpack.i.l.bf16 %v4272_v41  ;;  %v2876_v23 = vunpack.i.l.bf16 %v2875_v31  ;;  %v2877_v48 = vunpack.i.h.bf16 %v2875_v31 }
 0x39d   :  { %v1740_v30 = vsel %vm91_vm0, %v2866_v35, %v2886_v3  ;;  %v1741_v10 = vsel %vm91_vm0, %v2867_v18, %v2887_v2 }
 0x39e   :  { %v4284_v37 = vpop.permute.xlu0 %2879  ;;  %v4286_v47 = vpop.permute.xlu1 %2894  ;;  %v1763_v50 = vpack.c.bf16 %v1741_v10, %v1740_v30 }
 0x39f   :  { %v2896_v42 = vunpack.i.l.bf16 %v4286_v47  ;;  %v4804_v11 = vunpack.i.h.bf16 %v4286_v47 }
 0x3a0   :  { %1821 = vmatprep.subr.bf16.mxu1 %v1763_v50 }
 0x3a1   :  { %v1668_v6 = vsel %vm53_vm3, %v2876_v23, %v2896_v42  ;;  %v1669_v50 = vsel %vm53_vm3, %v2877_v48, %v4804_v11 }
 0x3a2   :  { %v4288_v22 = vpop.permute.xlu0 %2889  ;;  %v4290_v1 = vpop.permute.xlu1 %2899 }
 0x3a3   :  { %v2892_v29 = vunpack.i.h.bf16 %v4288_v22  ;;  %v2891_v16 = vunpack.i.l.bf16 %v4288_v22  ;;  %v2902_v22 = vunpack.i.h.bf16 %v4290_v1 }
 0x3a5   :  { %v1704_v49 = vsel %vm72_vm2, %v2871_v61, %v2891_v16  ;;  %v1705_v46 = vsel %vm72_vm2, %v2872_v5, %v2892_v29 }
 0x3a6   :  { %v4294_v17 = vpop.permute.xlu0 %2909  ;;  %v4296_v24 = vpop.permute.xlu1 %2904  ;;  %v1757_v10 = vpack.c.bf16 %v1705_v46, %v1704_v49  ;;  %v4803_v49 = vunpack.i.h.bf16 %v4284_v37  ;;  %v4802_v46 = vunpack.i.l.bf16 %v4284_v37 }
 0x3a7   :  { %v2907_v15 = vunpack.i.h.bf16 %v4296_v24  ;;  %v2906_v53 = vunpack.i.l.bf16 %v4296_v24 }
 0x3aa   :  { %v2920_v39 = vpop.permute.xlu0 %2919  ;;  %v4300_v20 = vpop.permute.xlu1 %2914 }
 0x3ab   :  { %v2922_v62 = vunpack.i.h.bf16 %v2920_v39  ;;  %v2921_v54 = vunpack.i.l.bf16 %v2920_v39 }
 0x3ad   :  { %v1743_v51 = vsel %vm91_vm0, %v2922_v62, %v2867_v18  ;;  %v1742_v27 = vsel %vm91_vm0, %v2921_v54, %v2866_v35  ;;  %v1744_v38 = vsel %vm91_vm0, %v2906_v53, %v2921_v54  ;;  %v1745_v58 = vsel %vm91_vm0, %v2907_v15, %v2922_v62 }
 0x3ae   :  { %v1762_v43 = vpack.c.bf16 %v1743_v51, %v1742_v27  ;;  %v2930_v7 = vpop.permute.xlu0 %2929  ;;  %v2925_v31 = vpop.permute.xlu1 %2924  ;;  %v1761_v30 = vpack.c.bf16 %v1745_v58, %v1744_v38  ;;  %v1751_v58 = vpack.c.bf16 %v1669_v50, %v1668_v6  ;;  %v4355_v50 = vld [vmem:[%s4800_s6] sm:$0xf] }
 0x3af   :  { %v2932_v18 = vunpack.i.h.bf16 %v2930_v7  ;;  %v2931_v24 = vunpack.i.l.bf16 %v2930_v7  ;;  %v2927_v39 = vunpack.i.h.bf16 %v2925_v31  ;;  %v2926_v35 = vunpack.i.l.bf16 %v2925_v31 }
 0x3b0   :  { %1780 = vmatprep.subr.bf16.mxu0 %v1761_v30  ;;  %1822 = vmatpush1.bf16.msra.mxu1 %v1762_v43 }
 0x3b1   :  { %v1707_v54 = vsel %vm72_vm2, %v2927_v39, %v2872_v5  ;;  %v1706_v62 = vsel %vm72_vm2, %v2926_v35, %v2871_v61  ;;  %1823 = vmatprep.subr.bf16.mxu1 %v1757_v10  ;;  %v1671_v7 = vsel %vm53_vm3, %v2932_v18, %v2877_v48  ;;  %v1670_v43 = vsel %vm53_vm3, %v2931_v24, %v2876_v23 }
 0x3b2   :  { %v1756_v51 = vpack.c.bf16 %v1707_v54, %v1706_v62  ;;  %v4334_v27 = vpop.permute.xlu0 %2939  ;;  %v2935_v38 = vpop.permute.xlu1 %2934  ;;  %v1750_v30 = vpack.c.bf16 %v1671_v7, %v1670_v43  ;;  %v2912_v54 = vunpack.i.h.bf16 %v4294_v17  ;;  %v2911_v62 = vunpack.i.l.bf16 %v4294_v17 }
 0x3b3   :  { %v2937_v5 = vunpack.i.h.bf16 %v2935_v38  ;;  %v2936_v31 = vunpack.i.l.bf16 %v2935_v38 }
 0x3b4   :  { %1824 = vmatpush1.bf16.msra.mxu1 %v1756_v51  ;;  %v1708_v43 = vsel %vm72_vm2, %v2911_v62, %v2926_v35 }
 0x3b5   :  { %1825 = vmatprep.subr.bf16.mxu1 %v1751_v58  ;;  %v1970_v61 = vsel %vm322_vm5, %v2936_v31, %v4802_v46  ;;  %v1971_v6 = vsel %vm322_vm5, %v2937_v5, %v4803_v49  ;;  %v2942_v49 = vunpack.i.h.bf16 %v4334_v27 }
 0x3b6   :  { %v4348_v10 = vpop.permute.xlu0 %2949  ;;  %v4350_v48 = vpop.permute.xlu1 %2944  ;;  %v1989_v23 = vpack.c.bf16 %v1971_v6, %v1970_v61  ;;  %v1709_v61 = vsel %vm72_vm2, %v2912_v54, %v2927_v39  ;;  %v2917_v6 = vunpack.i.h.bf16 %v4300_v20 }
 0x3b7   :  { %v1755_v35 = vpack.c.bf16 %v1709_v61, %v1708_v43  ;;  %v2952_v19 = vunpack.i.h.bf16 %v4348_v10  ;;  %v2951_v13 = vunpack.i.l.bf16 %v4348_v10 }
 0x3b8   :  { %1826 = vmatpush1.bf16.msra.mxu1 %v1750_v30  ;;  %v2916_v30 = vunpack.i.l.bf16 %v4300_v20  ;;  %v1673_v55 = vsel %vm53_vm3, %v2917_v6, %v2932_v18 }
 0x3b9   :  { %2009 = vmatprep.subr.bf16.mxu1 %v1989_v23 }
 0x3ba   :  { %v4359_v51 = vpop.permute.xlu0 %2954  ;;  %v2960_v38 = vpop.permute.xlu1 %2959  ;;  %v1672_v39 = vsel %vm53_vm3, %v2916_v30, %v2931_v24 }
 0x3bb   :  { %v2962_v58 = vunpack.i.h.bf16 %v2960_v38  ;;  %v2961_v7 = vunpack.i.l.bf16 %v2960_v38  ;;  %2502 = vmatmul.mubr.msk.bf16.vlgmr.msra.gmra.mxu1 %vm940_vm10, %v4355_v50  ;;  %v2957_v10 = vunpack.i.h.bf16 %v4359_v51 }
 0x3bc   :  { %2031 = vmatprep.mubr.bf16.mxu1 %v3136_v9 }
 0x3bd   :  { %v1747_v17 = vsel %vm91_vm0, %v2962_v58, %v2907_v15  ;;  %v1746_v23 = vsel %vm91_vm0, %v2961_v7, %v2906_v53  ;;  %v2941_v53 = vunpack.i.l.bf16 %v4334_v27 }
 0x3be   :  { %v1760_v38 = vpack.c.bf16 %v1747_v17, %v1746_v23  ;;  %v2970_v33 = vpop.permute.xlu0 %2969  ;;  %v4374_v56 = vpop.permute.xlu1 %2964 }
 0x3bf   :  { %v2972_v20 = vunpack.i.h.bf16 %v2970_v33  ;;  %v2971_v36 = vunpack.i.l.bf16 %v2970_v33  ;;  %v2967_v46 = vunpack.i.h.bf16 %v4374_v56  ;;  %v2966_v15 = vunpack.i.l.bf16 %v4374_v56 }
 0x3c0   :  { %1781 = vmatpush1.bf16.msra.mxu0 %v1760_v38 }
 0x3c1   :  { %v1711_v43 = vsel %vm72_vm2, %v2972_v20, %v2912_v54  ;;  %v1710_v24 = vsel %vm72_vm2, %v2971_v36, %v2911_v62  ;;  %v1973_v33 = vsel %vm322_vm5, %v2967_v46, %v2937_v5  ;;  %v1972_v18 = vsel %vm322_vm5, %v2966_v15, %v2936_v31  ;;  %1782 = vmatprep.subr.bf16.mxu0 %v1755_v35 }
 0x3c2   :  { %v1754_v61 = vpack.c.bf16 %v1711_v43, %v1710_v24  ;;  %v1988_v27 = vpack.c.bf16 %v1973_v33, %v1972_v18  ;;  %v4396_v17 = vpop.permute.xlu0 %2974  ;;  %v2980_v23 = vpop.permute.xlu1 %2979  ;;  %v1749_v54 = vpack.c.bf16 %v1673_v55, %v1672_v39  ;;  %v1736_v62 = vsel %vm91_vm0, %v2941_v53, %v2961_v7 }
 0x3c3   :  { %v2982_v38 = vunpack.i.h.bf16 %v2980_v23  ;;  %v2981_v11 = vunpack.i.l.bf16 %v2980_v23  ;;  %v1737_v5 = vsel %vm91_vm0, %v2942_v49, %v2962_v58  ;;  %v1738_v31 = vsel %vm91_vm0, %v2886_v3, %v2941_v53 }
 0x3c4   :  { %1783 = vmatpush1.bf16.msra.mxu0 %v1754_v61  ;;  %2010 = vmatpush1.bf16.msra.mxu1 %v1988_v27  ;;  %v1739_v55 = vsel %vm91_vm0, %v2887_v2, %v2942_v49  ;;  %v2947_v3 = vunpack.i.h.bf16 %v4350_v48  ;;  %v2946_v58 = vunpack.i.l.bf16 %v4350_v48  ;;  %v1765_v2 = vpack.c.bf16 %v1737_v5, %v1736_v62 }
 0x3c5   :  { %v1675_v35 = vsel %vm53_vm3, %v2982_v38, %v2917_v6  ;;  %v1674_v7 = vsel %vm53_vm3, %v2981_v11, %v2916_v30  ;;  %1784 = vmatprep.subr.bf16.mxu0 %v1749_v54  ;;  %2011 = vmatprep.subr.bf16.mxu1 %v1983_v59  ;;  %v2977_v49 = vunpack.i.h.bf16 %v4396_v17  ;;  %v2976_v6 = vunpack.i.l.bf16 %v4396_v17 }
 0x3c6   :  { %v1748_v39 = vpack.c.bf16 %v1675_v35, %v1674_v7  ;;  %v4419_v41 = vpop.permute.xlu0 %2989  ;;  %v4421_v53 = vpop.permute.xlu1 %2984  ;;  %v1700_v25 = vsel %vm72_vm2, %v2946_v58, %v2971_v36  ;;  %v1701_v8 = vsel %vm72_vm2, %v2947_v3, %v2972_v20  ;;  %v1764_v24 = vpack.c.bf16 %v1739_v55, %v1738_v31 }
 0x3c7   :  { %v2987_v30 = vunpack.i.h.bf16 %v4421_v53  ;;  %v2986_v43 = vunpack.i.l.bf16 %v4421_v53  ;;  %v1703_v33 = vsel %vm72_vm2, %v2892_v29, %v2947_v3  ;;  %v1702_v18 = vsel %vm72_vm2, %v2891_v16, %v2946_v58 }
 0x3c8   :  { %1785 = vmatpush1.bf16.msra.mxu0 %v1748_v39  ;;  %2012 = vmatpush1.bf16.msra.mxu1 %v1982_v40  ;;  %v1759_v61 = vpack.c.bf16 %v1701_v8, %v1700_v25  ;;  %v2956_v27 = vunpack.i.l.bf16 %v4359_v51  ;;  %v1664_v23 = vsel %vm53_vm3, %v2951_v13, %v2981_v11  ;;  %v1665_v29 = vsel %vm53_vm3, %v2952_v19, %v2982_v38 }
 0x3c9   :  { %1862 = vmatprep.subr.bf16.mxu0 %v1765_v2  ;;  %v1936_v59 = vsel %vm303_vm6, %v2976_v6, %v2986_v43  ;;  %v1937_v48 = vsel %vm303_vm6, %v2977_v49, %v2987_v30  ;;  %v2901_v16 = vunpack.i.l.bf16 %v4290_v1  ;;  %v1758_v54 = vpack.c.bf16 %v1703_v33, %v1702_v18 }
 0x3ca   :  { %v4444_v40 = vpop.permute.xlu0 %2999  ;;  %v4446_v36 = vpop.permute.xlu1 %2994  ;;  %v1977_v20 = vpack.c.bf16 %v1937_v48, %v1936_v59  ;;  %v1666_v11 = vsel %vm53_vm3, %v2896_v42, %v2951_v13  ;;  %v4811_v31 = vunpack.i.h.bf16 %v4286_v47  ;;  %v1753_v55 = vpack.c.bf16 %v1665_v29, %v1664_v23 }
 0x3cb   :  { %2501 = vmatmul.mubr.msk.bf16.vlgmr.msra.gmra.mxu0 %vm940_vm10, %v4355_v50  ;;  %v1966_v1 = vsel %vm322_vm5, %v2901_v16, %v2956_v27  ;;  %v1967_v35 = vsel %vm322_vm5, %v2902_v22, %v2957_v10  ;;  %v4812_v3 = vunpack.i.h.bf16 %v4284_v37  ;;  %v4813_v39 = vunpack.i.l.bf16 %v4284_v37 }
 0x3cc   :  { %1863 = vmatpush1.bf16.msra.mxu0 %v1764_v24  ;;  %2013 = vmatprep.subr.bf16.mxu1 %v1977_v20  ;;  %v1667_v38 = vsel %vm53_vm3, %v4811_v31, %v2952_v19  ;;  %v2992_v2 = vunpack.i.h.bf16 %v4419_v41  ;;  %v1991_v25 = vpack.c.bf16 %v1967_v35, %v1966_v1  ;;  %v2991_v8 = vunpack.i.l.bf16 %v4419_v41 }
 0x3cd   :  { %1864 = vmatprep.subr.bf16.mxu0 %v1759_v61  ;;  %1884 = vmatprep.mubr.bf16.mxu0 %v3136_v9  ;;  %v1752_v7 = vpack.c.bf16 %v1667_v38, %v1666_v11  ;;  %v1969_v58 = vsel %vm322_vm5, %v4812_v3, %v2902_v22  ;;  %v1968_v53 = vsel %vm322_vm5, %v4813_v39, %v2901_v16  ;;  %v2997_v59 = vunpack.i.h.bf16 %v4446_v36 }
 0x3ce   :  { %v4467_v62 = vpop.permute.xlu0 %3009  ;;  %v4469_v5 = vpop.permute.xlu1 %3004  ;;  %v2996_v48 = vunpack.i.l.bf16 %v4446_v36  ;;  %v1990_v13 = vpack.c.bf16 %v1969_v58, %v1968_v53  ;;  %v1935_v41 = vsel %vm303_vm6, %v2987_v30, %v2992_v2  ;;  %v3002_v61 = vunpack.i.h.bf16 %v4444_v40 }
 0x3cf   :  { %v3012_v24 = vunpack.i.h.bf16 %v4467_v62  ;;  %v3011_v19 = vunpack.i.l.bf16 %v4467_v62  ;;  %v3007_v37 = vunpack.i.h.bf16 %v4469_v5  ;;  %v3006_v20 = vunpack.i.l.bf16 %v4469_v5 }
 0x3d0   :  { %1865 = vmatpush1.bf16.msra.mxu0 %v1758_v54  ;;  %v3001_v23 = vunpack.i.l.bf16 %v4444_v40  ;;  %v1934_v29 = vsel %vm303_vm6, %v2986_v43, %v2991_v8  ;;  %v1932_v22 = vsel %vm303_vm6, %v2991_v8, %v2996_v48  ;;  %v1933_v30 = vsel %vm303_vm6, %v2992_v2, %v2997_v59 }
 0x3d1   :  { %1866 = vmatprep.subr.bf16.mxu0 %v1753_v55  ;;  %v2233_v43 = vsel %vm561_vm7, %v3012_v24, %v3002_v61  ;;  %v4814_v54 = vpack.c.bf16 %v4194_v14, %v4199_v0  ;;  %v2231_v35 = vsel %vm561_vm7, %v3002_v61, %v3007_v37  ;;  %v1979_v0 = vpack.c.bf16 %v1933_v30, %v1932_v22 }
 0x3d2   :  { %v4487_v42 = vpop.permute.xlu0 %3019  ;;  %v4489_v47 = vpop.permute.xlu1 %3014  ;;  %v2230_v1 = vsel %vm561_vm7, %v3001_v23, %v3006_v20  ;;  %v1978_v3 = vpack.c.bf16 %v1935_v41, %v1934_v29 }
 0x3d3   :  { %v3021_v40 = vunpack.i.l.bf16 %v4487_v42  ;;  %v3016_v16 = vunpack.i.l.bf16 %v4489_v47  ;;  %v3022_v11 = vunpack.i.h.bf16 %v4487_v42  ;;  %v3017_v31 = vunpack.i.h.bf16 %v4489_v47 }
 0x3d4   :  { %1867 = vmatpush1.bf16.msra.mxu0 %v1752_v7  ;;  %v4815_v47 = vpack.c.bf16 %v4191_v44, %v4188_v28  ;;  %v2249_v2 = vpack.c.bf16 %v2231_v35, %v2230_v1 }
 0x3d5   :  { %2050 = vmatprep.subr.bf16.mxu0 %v1991_v25  ;;  %v2194_v25 = vsel %vm542_vm9, %v3016_v16, %v3021_v40  ;;  %v2195_v17 = vsel %vm542_vm9, %v3017_v31, %v3022_v11 }
 0x3d6   :  { %v4507_v33 = vpop.permute.xlu0 %3029  ;;  %v4509_v18 = vpop.permute.xlu1 %3024 }
 0x3d7   :  { %2503 = vmatmul.mubr.msk.bf16.vlgmr.msra.gmra.mxu0 %vm940_vm10, %v4355_v50  ;;  %v2232_v50 = vsel %vm561_vm7, %v3011_v19, %v3001_v23  ;;  %v3027_v28 = vunpack.i.h.bf16 %v4509_v18  ;;  %v3026_v44 = vunpack.i.l.bf16 %v4509_v18  ;;  %v3032_v29 = vunpack.i.h.bf16 %v4507_v33 }
 0x3d8   :  { %2051 = vmatpush1.bf16.msra.mxu0 %v1990_v13  ;;  %2072 = vmatprep.mubr.bf16.mxu0 %v3136_v9  ;;  %v2248_v58 = vpack.c.bf16 %v2233_v43, %v2232_v50  ;;  %v3031_v22 = vunpack.i.l.bf16 %v4507_v33  ;;  %v4585_v43 = vld [vmem:[%s4800_s6 + $0x4] sm:$0xf] }
 0x3d9   :  { %2052 = vmatprep.subr.bf16.mxu0 %v4814_v54  ;;  %v2197_v51 = vsel %vm542_vm9, %v3027_v28, %v3017_v31 }
 0x3da   :  { %v3040_v38 = vpop.permute.xlu0 %3039  ;;  %v4543_v55 = vpop.permute.xlu1 %3034 }
 0x3db   :  { %v3042_v7 = vunpack.i.h.bf16 %v3040_v38  ;;  %v3041_v14 = vunpack.i.l.bf16 %v3040_v38  ;;  %v3037_v30 = vunpack.i.h.bf16 %v4543_v55  ;;  %v3036_v50 = vunpack.i.l.bf16 %v4543_v55 }
 0x3dc   :  { %2053 = vmatpush1.bf16.msra.mxu0 %v4815_v47  ;;  %v1930_v47 = vsel %vm303_vm6, %v2996_v48, %v3031_v22  ;;  %v4816_v48 = vpack.c.bf16 %v4162_v34, %v4170_v63 }
 0x3dd   :  { %v1938_v39 = vsel %vm303_vm6, %v3041_v14, %v2976_v6  ;;  %v1939_v53 = vsel %vm303_vm6, %v3042_v7, %v2977_v49  ;;  %2054 = vmatprep.subr.bf16.mxu0 %v1979_v0 }
 0x3de   :  { %v1976_v8 = vpack.c.bf16 %v1939_v53, %v1938_v39  ;;  %v4570_v13 = vpop.permute.xlu0 %3044  ;;  %v3050_v6 = vpop.permute.xlu1 %3049  ;;  %v1928_v53 = vsel %vm303_vm6, %v3031_v22, %v3041_v14 }
 0x3df   :  { %v3047_v49 = vunpack.i.h.bf16 %v4570_v13  ;;  %v3046_v41 = vunpack.i.l.bf16 %v4570_v13  ;;  %v3052_v61 = vunpack.i.h.bf16 %v3050_v6  ;;  %v3051_v23 = vunpack.i.l.bf16 %v3050_v6 }
 0x3e0   :  { %2014 = vmatpush1.bf16.msra.mxu1 %v1976_v8  ;;  %2055 = vmatpush1.bf16.msra.mxu0 %v1978_v3  ;;  %v2243_v3 = vpack.c.bf16 %v2195_v17, %v2194_v25  ;;  %v1931_v8 = vsel %vm303_vm6, %v2997_v59, %v3032_v29 }
 0x3e1   :  { %v1965_v54 = vsel %vm322_vm5, %v2957_v10, %v3052_v61  ;;  %v1964_v33 = vsel %vm322_vm5, %v2956_v27, %v3051_v23  ;;  %2269 = vmatprep.subr.bf16.mxu0 %v2249_v2  ;;  %v1974_v38 = vsel %vm322_vm5, %v3051_v23, %v2966_v15  ;;  %v1975_v55 = vsel %vm322_vm5, %v3052_v61, %v2967_v46 }
 0x3e2   :  { %v2196_v10 = vsel %vm542_vm9, %v3026_v44, %v3016_v16  ;;  %v1992_v27 = vpack.c.bf16 %v1965_v54, %v1964_v33  ;;  %v3060_v1 = vpop.permute.xlu0 %3059  ;;  %v4611_v35 = vpop.permute.xlu1 %3054  ;;  %v1993_v15 = vpack.c.bf16 %v1975_v55, %v1974_v38  ;;  %v2158_v46 = vsel %vm523_vm8, %v3036_v50, %v3046_v41 }
 0x3e3   :  { %v3057_v56 = vunpack.i.h.bf16 %v4611_v35  ;;  %v3056_v0 = vunpack.i.l.bf16 %v4611_v35  ;;  %2505 = vmatmul.mubr.msk.bf16.vlgmr.msra.gmra.mxu1 %vm940_vm10, %v4585_v43  ;;  %2506 = vmatmul.mubr.msk.bf16.vlgmr.msra.gmra.mxu0 %vm940_vm10, %v4585_v43  ;;  %v2159_v16 = vsel %vm523_vm8, %v3037_v30, %v3047_v49  ;;  %v3061_v31 = vunpack.i.l.bf16 %v3060_v1 }
 0x3e4   :  { %2091 = vmatprep.subr.bf16.mxu1 %v1993_v15  ;;  %2270 = vmatpush1.bf16.msra.mxu0 %v2248_v58  ;;  %v3062_v39 = vunpack.i.h.bf16 %v3060_v1  ;;  %v1929_v2 = vsel %vm303_vm6, %v3032_v29, %v3042_v7  ;;  %v2242_v58 = vpack.c.bf16 %v2197_v51, %v2196_v10  ;;  %v2237_v17 = vpack.c.bf16 %v2159_v16, %v2158_v46 }
 0x3e5   :  { %2092 = vmatpush1.bf16.msra.mxu1 %v1992_v27  ;;  %2271 = vmatprep.subr.bf16.mxu0 %v2243_v3  ;;  %v2160_v14 = vsel %vm523_vm8, %v3056_v0, %v3036_v50  ;;  %v2161_v36 = vsel %vm523_vm8, %v3057_v56, %v3037_v30  ;;  %v2228_v34 = vsel %vm561_vm7, %v3006_v20, %v3061_v31 }
 0x3e6   :  { %v3075_v25 = vpop.permute.xlu0 %3074  ;;  %v3065_v6 = vpop.permute.xlu1 %3064  ;;  %2093 = vmatprep.subr.bf16.mxu1 %v4816_v48  ;;  %2291 = vmatprep.mubr.bf16.mxu0 %v3136_v9  ;;  %v1981_v63 = vpack.c.bf16 %v1929_v2, %v1928_v53  ;;  %v2229_v61 = vsel %vm561_vm7, %v3007_v37, %v3062_v39  ;;  %v4817_v23 = vpack.c.bf16 %v4159_v26, %v4167_v32  ;;  %v4670_v32 = vld [vmem:[%s4800_s6 + $0x8] sm:$0xf] }
 0x3e7   :  { %v3067_v59 = vunpack.i.h.bf16 %v3065_v6  ;;  %v3066_v7 = vunpack.i.l.bf16 %v3065_v6  ;;  %2113 = vmatprep.mubr.bf16.mxu1 %v3136_v9  ;;  %v1980_v30 = vpack.c.bf16 %v1931_v8, %v1930_v47  ;;  %v2236_v20 = vpack.c.bf16 %v2161_v36, %v2160_v14 }
 0x3e8   :  { %2272 = vmatpush1.bf16.msra.mxu0 %v2242_v58  ;;  %v2250_v55 = vpack.c.bf16 %v2229_v61, %v2228_v34  ;;  %v3077_v10 = vunpack.i.h.bf16 %v3075_v25  ;;  %v3076_v51 = vunpack.i.l.bf16 %v3075_v25 }
 0x3e9   :  { %2094 = vmatpush1.bf16.msra.mxu1 %v4817_v23  ;;  %2273 = vmatprep.subr.bf16.mxu0 %v2237_v17  ;;  %v2226_v29 = vsel %vm561_vm7, %v3061_v31, %v3066_v7  ;;  %v2227_v22 = vsel %vm561_vm7, %v3062_v39, %v3067_v59 }
 0x3ea   :  { %v3080_v50 = vpop.permute.xlu0 %3079  ;;  %v3070_v54 = vpop.permute.xlu1 %3069  ;;  %2095 = vmatprep.subr.bf16.mxu1 %v1981_v63  ;;  %v2251_v26 = vpack.c.bf16 %v2227_v22, %v2226_v29 }
 0x3eb   :  { %v3082_v5 = vunpack.i.h.bf16 %v3080_v50  ;;  %v3081_v33 = vunpack.i.l.bf16 %v3080_v50  ;;  %v3072_v38 = vunpack.i.h.bf16 %v3070_v54  ;;  %v3071_v37 = vunpack.i.l.bf16 %v3070_v54 }
 0x3ec   :  { %2274 = vmatpush1.bf16.msra.mxu0 %v2236_v20 }
 0x3ed   :  { %v2224_v27 = vsel %vm561_vm7, %v3066_v7, %v3081_v33  ;;  %v2225_v1 = vsel %vm561_vm7, %v3067_v59, %v3082_v5  ;;  %2096 = vmatpush1.bf16.msra.mxu1 %v1980_v30  ;;  %v2193_v15 = vsel %vm542_vm9, %v3022_v11, %v3072_v38  ;;  %v2192_v46 = vsel %vm542_vm9, %v3021_v40, %v3071_v37 }
 0x3ee   :  { %v3085_v16 = vpop.permute.xlu0 %3084  ;;  %v3090_v31 = vpop.permute.xlu1 %3089  ;;  %2310 = vmatprep.subr.bf16.mxu1 %v2251_v26  ;;  %v2234_v3 = vsel %vm561_vm7, %v3081_v33, %v3011_v19  ;;  %v2235_v47 = vsel %vm561_vm7, %v3082_v5, %v3012_v24  ;;  %v2252_v39 = vpack.c.bf16 %v2225_v1, %v2224_v27  ;;  %v2190_v19 = vsel %vm542_vm9, %v3071_v37, %v3076_v51 }
 0x3ef   :  { %v3087_v11 = vunpack.i.h.bf16 %v3085_v16  ;;  %v3092_v53 = vunpack.i.h.bf16 %v3090_v31  ;;  %v3091_v42 = vunpack.i.l.bf16 %v3090_v31  ;;  %2509 = vmatmul.mubr.msk.bf16.vlgmr.msra.gmra.mxu0 %vm940_vm10, %v4670_v32  ;;  %v3086_v40 = vunpack.i.l.bf16 %v3085_v16 }
 0x3f0   :  { %2507 = vmatmul.mubr.msk.bf16.vlgmr.msra.gmra.mxu1 %vm940_vm10, %v4585_v43  ;;  %v2253_v2 = vpack.c.bf16 %v2235_v47, %v2234_v3  ;;  %v2191_v62 = vsel %vm542_vm9, %v3072_v38, %v3077_v10  ;;  %2373 = vmatprep.mubr.bf16.mxu0 %v3136_v9  ;;  %v2244_v58 = vpack.c.bf16 %v2193_v15, %v2192_v46 }
 0x3f1   :  { %v2189_v24 = vsel %vm542_vm9, %v3077_v10, %v3092_v53  ;;  %v2188_v8 = vsel %vm542_vm9, %v3076_v51, %v3091_v42  ;;  %2311 = vmatpush1.bf16.msra.mxu1 %v2250_v55  ;;  %v2245_v6 = vpack.c.bf16 %v2191_v62, %v2190_v19  ;;  %v2198_v48 = vsel %vm542_vm9, %v3091_v42, %v3026_v44 }
 0x3f2   :  { %2351 = vmatprep.subr.bf16.mxu0 %v2253_v2  ;;  %v3100_v25 = vpop.permute.xlu0 %3099  ;;  %v3095_v43 = vpop.permute.xlu1 %3094  ;;  %2332 = vmatprep.mubr.bf16.mxu1 %v3136_v9  ;;  %v2156_v7 = vsel %vm523_vm8, %v3046_v41, %v3086_v40  ;;  %v2157_v34 = vsel %vm523_vm8, %v3047_v49, %v3087_v11  ;;  %v2246_v63 = vpack.c.bf16 %v2189_v24, %v2188_v8 }
 0x3f3   :  { %2352 = vmatpush1.bf16.msra.mxu0 %v2252_v39  ;;  %v3102_v17 = vunpack.i.h.bf16 %v3100_v25  ;;  %v3101_v14 = vunpack.i.l.bf16 %v3100_v25  ;;  %v3097_v36 = vunpack.i.h.bf16 %v3095_v43  ;;  %v3096_v59 = vunpack.i.l.bf16 %v3095_v43  ;;  %2312 = vmatprep.subr.bf16.mxu1 %v2245_v6 }
 0x3f4   :  { %v2199_v44 = vsel %vm542_vm9, %v3092_v53, %v3027_v28  ;;  %v2238_v22 = vpack.c.bf16 %v2157_v34, %v2156_v7 }
 0x3f5   :  { %v2153_v9 = vsel %vm523_vm8, %v3097_v36, %v3102_v17  ;;  %v2152_v61 = vsel %vm523_vm8, %v3096_v59, %v3101_v14  ;;  %v2247_v23 = vpack.c.bf16 %v2199_v44, %v2198_v48  ;;  %2313 = vmatpush1.bf16.msra.mxu1 %v2244_v58  ;;  %v2154_v13 = vsel %vm523_vm8, %v3086_v40, %v3096_v59 }
 0x3f6   :  { %v2155_v49 = vsel %vm523_vm8, %v3087_v11, %v3097_v36  ;;  %v2162_v18 = vsel %vm523_vm8, %v3101_v14, %v3056_v0  ;;  %v2163_v28 = vsel %vm523_vm8, %v3102_v17, %v3057_v56  ;;  %v2240_v30 = vpack.c.bf16 %v2153_v9, %v2152_v61 }
 0x3f7   :  { %2353 = vmatprep.subr.bf16.mxu0 %v2247_v23  ;;  %v2239_v41 = vpack.c.bf16 %v2155_v49, %v2154_v13  ;;  %v2241_v29 = vpack.c.bf16 %v2163_v28, %v2162_v18 }
 0x3f8   :  { %2354 = vmatpush1.bf16.msra.mxu0 %v2246_v63 }
 0x3f9   :  { %2314 = vmatprep.subr.bf16.mxu1 %v2239_v41  ;;  %2355 = vmatprep.subr.bf16.mxu0 %v2241_v29 }
 0x3fa   :  { %2315 = vmatpush1.bf16.msra.mxu1 %v2238_v22 }
 0x3fc   :  { %2356 = vmatpush1.bf16.msra.mxu0 %v2240_v30 }
 0x3fd   :  { %2510 = vmatmul.mubr.msk.bf16.vlgmr.msra.gmra.mxu1 %vm940_vm10, %v4670_v32 }
 0x3ff   :  { %2511 = vmatmul.mubr.msk.bf16.vlgmr.msra.gmra.mxu0 %vm940_vm10, %v4670_v32  ;;  %v1896_v16 = vpop.permute.xlu1 %1895 }
 0x47b   :  { %v1845_v35 = vpop.f32.mrf.mxu1 }
 0x47c   :  { %v1900_v36 = vadd.f32 %v1896_v16, %v1845_v35 }
 0x47d   :  { %v1847_v0 = vpop.f32.mrf.mxu1 }
 0x47f   :  { %v1849_v21 = vpop.f32.mrf.mxu1 }
 0x481   :  { %v1850_v56 = vpop.f32.mrf.mxu1 }
 0x48b   :  { %v1804_v20 = vpop.f32.mrf.mxu0 }
 0x48c   :  { %v1898_v31 = vadd.f32 %v1896_v16, %v1804_v20 }
 0x48d   :  { %v1806_v50 = vpop.f32.mrf.mxu0 }
 0x48e   :  { %v1899_v3 = vadd.f32 %v1896_v16, %v1806_v50 }
 0x48f   :  { %v1808_v54 = vpop.f32.mrf.mxu0 }
 0x491   :  { %v1809_v5 = vpop.f32.mrf.mxu0 }
 0x497   :  { %v1886_v33 = vpop.f32.mrf.mxu0 }
 0x498   :  { %v1902_v59 = vadd.f32 %v1896_v16, %v1886_v33 }
 0x499   :  { %v1888_v38 = vpop.f32.mrf.mxu0 }
 0x49a   :  { %v1903_v61 = vadd.f32 %v1896_v16, %v1888_v38 }
 0x49b   :  { %v1890_v37 = vpop.f32.mrf.mxu0 }
 0x49d   :  { %v1891_v55 = vpop.f32.mrf.mxu0 }
 0x4a3   :  { %v2033_v26 = vpop.f32.mrf.mxu1  ;;  %v2074_v10 = vpop.f32.mrf.mxu0 }
 0x4a4   :  { %v2122_v47 = vadd.f32 %v2033_v26, %v1898_v31  ;;  %v2124_v7 = vadd.f32 %v2074_v10, %v1900_v36 }
 0x4a5   :  { %v2035_v51 = vpop.f32.mrf.mxu1  ;;  %v2076_v27 = vpop.f32.mrf.mxu0 }
 0x4a6   :  { %v2123_v11 = vadd.f32 %v2035_v51, %v1899_v3 }
 0x4a7   :  { %v2037_v1 = vpop.f32.mrf.mxu1  ;;  %v2078_v15 = vpop.f32.mrf.mxu0 }
 0x4a9   :  { %v2038_v46 = vpop.f32.mrf.mxu1  ;;  %v2079_v32 = vpop.f32.mrf.mxu0 }
 0x4af   :  { %v2293_v39 = vpop.f32.mrf.mxu0 }
 0x4b0   :  { %v2382_v53 = vadd.f32 %v2293_v39, %v2122_v47  ;;  %v2115_v42 = vpop.f32.mrf.mxu1 }
 0x4b1   :  { %v2295_v40 = vpop.f32.mrf.mxu0  ;;  %v2126_v44 = vadd.f32 %v2115_v42, %v1902_v59 }
 0x4b2   :  { %v4743_v2 = vmul.f32 %v2382_v53, %v3509_v45  ;;  %v2383_v19 = vadd.f32 %v2295_v40, %v2123_v11  ;;  %v2117_v62 = vpop.f32.mrf.mxu1  ;;  %v1901_v45 = vadd.f32 %v1896_v16, %v1847_v0 }
 0x4b3   :  { %v2297_v24 = vpop.f32.mrf.mxu0  ;;  %v2127_v28 = vadd.f32 %v2117_v62, %v1903_v61 }
 0x4b4   :  { %v2394_v8 = vsub.f32 0.0, %v4743_v2  ;;  %v4747_v58 = vmul.f32 %v2383_v19, %v3520_v60  ;;  %v2119_v25 = vpop.f32.mrf.mxu1  ;;  %v2125_v63 = vadd.f32 %v2076_v27, %v1901_v45  ;;  %v2430_v27 = vmax.f32 %v4743_v2, 0.0 }
 0x4b5   :  { %v2298_v43 = vpop.f32.mrf.mxu0 }
 0x4b6   :  { %v2400_v6 = vmul.f32 1.442695, %v2394_v8  ;;  %v2395_v48 = vsub.f32 0.0, %v4747_v58  ;;  %v2120_v17 = vpop.f32.mrf.mxu1  ;;  %v2431_v32 = vmax.f32 %v4747_v58, 0.0 }
 0x4b8   :  { %3109 = vpow2.f32 %v2400_v6  ;;  %v2402_v14 = vmul.f32 1.442695, %v2395_v48 }
 0x4ba   :  { %3111 = vpow2.f32 %v2402_v14 }
 0x4bd   :  { %v2334_v34 = vpop.f32.mrf.mxu1 }
 0x4be   :  { %v2384_v9 = vadd.f32 %v2334_v34, %v2124_v7 }
 0x4bf   :  { %v2375_v60 = vpop.f32.mrf.mxu0  ;;  %v2336_v23 = vpop.f32.mrf.mxu1 }
 0x4c0   :  { %v2390_v13 = vmul.f32 %v2384_v9, %v3528_v12  ;;  %v2386_v49 = vadd.f32 %v2375_v60, %v2126_v44  ;;  %v2385_v18 = vadd.f32 %v2336_v23, %v2125_v63 }
 0x4c1   :  { %v2377_v41 = vpop.f32.mrf.mxu0  ;;  %v2338_v29 = vpop.f32.mrf.mxu1 }
 0x4c2   :  { %v2396_v22 = vsub.f32 0.0, %v2390_v13  ;;  %v2392_v30 = vmul.f32 %v2386_v49, %v3560_v4  ;;  %v4753_v35 = vmul.f32 %v2385_v18, %v3563_v52  ;;  %v2387_v0 = vadd.f32 %v2377_v41, %v2127_v28 }
 0x4c3   :  { %v2379_v21 = vpop.f32.mrf.mxu0  ;;  %v2339_v56 = vpop.f32.mrf.mxu1 }
 0x4c4   :  { %v2404_v20 = vmul.f32 1.442695, %v2396_v22  ;;  %v2398_v50 = vsub.f32 0.0, %v2392_v30  ;;  %v2397_v54 = vsub.f32 0.0, %v4753_v35  ;;  %v2393_v12 = vmul.f32 %v2387_v0, %v3568_v57 }
 0x4c5   :  { %v3110_v5 = vpop.eup %3109  ;;  %v2380_v33 = vpop.f32.mrf.mxu0  ;;  %v2434_v8 = vmax.f32 %v2392_v30, 0.0  ;;  %v2433_v43 = vmax.f32 %v4753_v35, 0.0 }
 0x4c6   :  { %v2412_v38 = vadd.f32 1.0, %v3110_v5  ;;  %3113 = vpow2.f32 %v2404_v20  ;;  %v2408_v37 = vmul.f32 1.442695, %v2398_v50  ;;  %v2406_v26 = vmul.f32 1.442695, %v2397_v54 }
 0x4c7   :  { %v3112_v55 = vpop.eup %3111  ;;  %v2399_v4 = vsub.f32 0.0, %v2393_v12  ;;  %v2435_v17 = vmax.f32 %v2393_v12, 0.0 }
 0x4c8   :  { %3115 = vrcp.f32 %v2412_v38  ;;  %v2413_v52 = vadd.f32 1.0, %v3112_v55 }
 0x4c9   :  { %3117 = vpow2.f32 %v2408_v37  ;;  %v2410_v10 = vmul.f32 1.442695, %v2399_v4 }
 0x4ca   :  { %3119 = vrcp.f32 %v2413_v52 }
 0x4cb   :  { %3121 = vpow2.f32 %v2406_v26 }
 0x4cc   :  { %3123 = vpow2.f32 %v2410_v10 }
 0x4d3   :  { %v3114_v51 = vpop.eup %3113 }
 0x4d4   :  { %v2414_v57 = vadd.f32 1.0, %v3114_v51 }
 0x4d5   :  { %v3116_v1 = vpop.eup %3115 }
 0x4d6   :  { %v3118_v15 = vpop.eup %3117  ;;  %v2437_v46 = vsel %vm2436_vm11, %v3116_v1, %v2430_v27  ;;  %3125 = vrcp.f32 %v2414_v57 }
 0x4d7   :  { %v3120_v16 = vpop.eup %3119  ;;  %v2444_v31 = vsel %vm2443_vm12, %v2437_v46, %v4743_v2  ;;  %v2416_v3 = vadd.f32 1.0, %v3118_v15  ;;  %v2432_v2 = vmax.f32 %v2390_v13, 0.0 }
 0x4d8   :  { %v3122_v47 = vpop.eup %3121  ;;  %2450 = vst [vmem:[%s4801_s8] sm:$0xff] %v2444_v31  ;;  %v2438_v39 = vsel %vm2436_vm11, %v3120_v16, %v2431_v32 }
 0x4d9   :  { %v3124_v11 = vpop.eup %3123  ;;  %v2445_v53 = vsel %vm2443_vm12, %v2438_v39, %v4747_v58  ;;  %3127 = vrcp.f32 %v2416_v3  ;;  %v2415_v42 = vadd.f32 1.0, %v3122_v47 }
 0x4da   :  { %2451 = vst [vmem:[%s4801_s8 + $0x8] sm:$0xff] %v2445_v53  ;;  %v2417_v40 = vadd.f32 1.0, %v3124_v11 }
 0x4db   :  { %3129 = vrcp.f32 %v2415_v42 }
 0x4dc   :  { %3131 = vrcp.f32 %v2417_v40 }
 0x4e3   :  { %v3126_v19 = vpop.eup %3125 }
 0x4e4   :  { %v2439_v62 = vsel %vm2436_vm11, %v3126_v19, %v2432_v2 }
 0x4e5   :  { %v2446_v24 = vsel %vm2443_vm12, %v2439_v62, %v2390_v13 }
 0x4e6   :  { %v3128_v25 = vpop.eup %3127  ;;  %2452 = vst [vmem:[%s4801_s8 + $0x10] sm:$0xff] %v2446_v24 }
 0x4e7   :  { %v2441_v58 = vsel %vm2436_vm11, %v3128_v25, %v2434_v8 }
 0x4e8   :  { %v3130_v6 = vpop.eup %3129  ;;  %v2448_v48 = vsel %vm2443_vm12, %v2441_v58, %v2392_v30 }
 0x4e9   :  { %v3132_v14 = vpop.eup %3131  ;;  %2454 = vst [vmem:[%s4801_s8 + $0x20] sm:$0xff] %v2448_v48  ;;  %v2440_v36 = vsel %vm2436_vm11, %v3130_v6, %v2433_v43 }
 0x4ea   :  { %v2447_v45 = vsel %vm2443_vm12, %v2440_v36, %v4753_v35  ;;  %v2442_v59 = vsel %vm2436_vm11, %v3132_v14, %v2435_v17 }
 0x4eb   :  { %2453 = vst [vmem:[%s4801_s8 + $0x18] sm:$0xff] %v2447_v45  ;;  %v2449_v7 = vsel %vm2443_vm12, %v2442_v59, %v2393_v12 }
 0x4ec   :  { %2455 = vst [vmem:[%s4801_s8 + $0x28] sm:$0xff] %v2449_v7 }

</bundles_post_ra>
